<compile_context>
chip_gen: v5e
topology: v5e:2x2
jax: 0.10.0
libtpu: 0.0.40
codegen_flags: <defaults>
</compile_context>

<pallas_src>
import functools

import jax
import jax.numpy as jnp
import numpy as np
from jax.experimental import pallas as pl
from jax.experimental.pallas import tpu as pltpu

BN_EPS = 1e-5
LEAKY_SLOPE = 0.1


def _tile_working_set_bytes(TH, W, Cin, Cmid, Cout):
    thw = TH * W
    xm = thw * Cin * 2            # bf16 main input block
    xt = 2 * W * Cin * 2          # bf16 tail (halo) input block
    out = thw * Cout * 2          # bf16 output block
    pad = (TH + 2) * W * 3 * Cmid * 2  # bf16 stacked-intermediate scratch
    # double-buffered pipelined blocks + resident scratch (weights are tiny)
    return 2 * (xm + xt + out) + pad


def _choose_tile_h(H, W, Cin, Cmid, Cout, budget=24 * 1024 * 1024):
    """Largest even divisor of H whose per-step working set fits `budget`
    (conservative for v7x's 64 MiB physical VMEM; v5e/v6e can go ~2x larger)."""
    best = 2
    for th in range(2, H + 1, 2):
        if H % th == 0 and _tile_working_set_bytes(th, W, Cin, Cmid, Cout) <= budget:
            best = th
    return best


def _vmem_limit_bytes(TH, W, Cin, Cmid, Cout):
    ws = _tile_working_set_bytes(TH, W, Cin, Cmid, Cout)
    # Headroom for Mosaic internal scratch; clamp into a range that is safe on
    # v7x (64 MiB physical) yet lets v5e/v6e (128 MiB) run larger tiles.
    return int(min(100 * 1024 * 1024, max(32 * 1024 * 1024, 3 * ws)))


def _conv1_kx_stack(xpart, w1, b1, W):
    """1x1 conv (+ folded BN1 bias) + LeakyReLU on a flattened (R, Cin) slab
    of full image rows (R % W == 0), then build the kx = -1 / 0 / +1
    column-shifted copies.  Returns bf16 (left, mid, right)."""
    R = xpart.shape[0]
    h = jnp.dot(xpart, w1, preferred_element_type=jnp.float32)   # MXU, f32 acc
    h = h + b1
    h = jnp.where(h >= 0.0, h, LEAKY_SLOPE * h)                  # LeakyReLU(0.1)
    # Column index of every flattened row as a cheap (R, 1) mask operand.
    col = jax.lax.broadcasted_iota(jnp.int32, (R, 1), 0) % W
    # A +/-1 column shift is a +/-1 sublane roll of the flattened slab (XLU
    # slot); the wrapped first/last column is masked to zero.  pltpu.roll only
    # takes non-negative shifts, so "-1" is expressed as R - 1 (cyclic).
    left = jnp.where(col >= 1, pltpu.roll(h, 1, axis=0), 0.0)        # h[i-1]
    right = jnp.where(col <= W - 2, pltpu.roll(h, R - 1, axis=0), 0.0)  # h[i+1]
    return (left.astype(jnp.bfloat16), h.astype(jnp.bfloat16),
            right.astype(jnp.bfloat16))


def basic_block_kernel(xm_ref, xt_ref, w1_ref, b1_ref, w2_ref, b2_ref,
                       o_ref, pad_ref, *, TH, W):
    # xm_ref : (1, TH*W, Cin)      bf16  padded rows [t*TH, t*TH+TH)
    # xt_ref : (1, 2*W,  Cin)      bf16  padded rows [t*TH+TH, t*TH+TH+2)
    # w1_ref : (Cin, Cmid)         bf16  1x1 conv weight, BN1 scale folded
    # b1_ref : (1, Cmid)           f32   folded BN1 bias
    # w2_ref : (3, 3*Cmid, Cout)   bf16  3x3 conv weight [ky, kx*Cmid + c, o]
    # b2_ref : (1, Cout)           f32   folded BN2 bias
    # o_ref  : (1, TH*W, Cout)     bf16  output tile (original rows t*TH..+TH-1)
    # pad_ref: ((TH+2)*W, 3*Cmid)  bf16  kx-stacked, row-halo'd intermediate
    t = pl.program_id(1)
    n_tiles = pl.num_programs(1)
    THW = TH * W
    Cmid = w1_ref.shape[1]

    lm, hm, rm = _conv1_kx_stack(xm_ref[0], w1_ref[...], b1_ref[...], W)
    lt, ht, rt = _conv1_kx_stack(xt_ref[0], w1_ref[...], b1_ref[...], W)

    # Lane-sliced bf16 stores of the kx-shifted channel stack.
    # pad-local row p corresponds to padded image row t*TH + p.
    pad_ref[0:THW, 0:Cmid] = lm
    pad_ref[0:THW, Cmid:2 * Cmid] = hm
    pad_ref[0:THW, 2 * Cmid:3 * Cmid] = rm
    pad_ref[THW:THW + 2 * W, 0:Cmid] = lt
    pad_ref[THW:THW + 2 * W, Cmid:2 * Cmid] = ht
    pad_ref[THW:THW + 2 * W, 2 * Cmid:3 * Cmid] = rt

    # Image-boundary halo rows must be zero in h-space (conv1 of the host-side
    # zero padding row is bias + LeakyReLU != 0), so overwrite them.
    @pl.when(t == 0)
    def _():
        pad_ref[0:W, :] = jnp.zeros((W, 3 * Cmid), jnp.bfloat16)

    @pl.when(t == n_tiles - 1)
    def _():
        pad_ref[(TH + 1) * W:(TH + 2) * W, :] = jnp.zeros((W, 3 * Cmid),
                                                          jnp.bfloat16)

    # conv2 (3x3, pad 1): 3 matmuls over 8-aligned ky row windows, K = 3*Cmid,
    # fused f32 accumulation (no VMEM accumulator round-trips).
    acc = jnp.dot(pad_ref[0:THW, :], w2_ref[0],
                  preferred_element_type=jnp.float32)
    acc = acc + jnp.dot(pad_ref[W:W + THW, :], w2_ref[1],
                        preferred_element_type=jnp.float32)
    acc = acc + jnp.dot(pad_ref[2 * W:2 * W + THW, :], w2_ref[2],
                        preferred_element_type=jnp.float32)

    out = acc + b2_ref[...]
    out = jnp.where(out >= 0.0, out, LEAKY_SLOPE * out)

    # Residual: original rows t*TH .. t*TH+TH-1 == xm rows [1, TH) ++ xt row 0.
    res = jnp.concatenate([xm_ref[0, W:THW, :], xt_ref[0, 0:W, :]], axis=0)
    o_ref[0] = (out + res.astype(jnp.float32)).astype(o_ref.dtype)


def basic_block_pallas(x_nhwc, w1, b1, w2, b2, *, tile_h=None):
    """x_nhwc: (N, H, W, Cin) -> (N, H, W, Cout) bfloat16 (NHWC)."""
    N, H, W, Cin = x_nhwc.shape
    Cmid = w1.shape[1]
    Cout = w2.shape[2]
    assert Cout == Cin, "residual add requires planes[1] == inplanes"
    assert W % 8 == 0, "W must be a sublane multiple for aligned ky row windows"
    assert H % 2 == 0, "H must be even"

    TH = _choose_tile_h(H, W, Cin, Cmid, Cout) if tile_h is None else tile_h
    assert TH % 2 == 0 and H % TH == 0, "tile_h must be an even divisor of H"
    n_tiles = H // TH
    THW = TH * W

    # bf16 activations in HBM (this block is HBM-bandwidth bound); one zero
    # spatial row of padding above/below so every tile's (TH+2)-row halo
    # window is an in-bounds slice covered by two non-overlapping BlockSpecs.
    x_pad = jnp.pad(x_nhwc.astype(jnp.bfloat16).reshape(N, H * W, Cin),
                    ((0, 0), (W, W), (0, 0)))

    kernel = functools.partial(basic_block_kernel, TH=TH, W=W)
    out = pl.pallas_call(
        kernel,
        out_shape=jax.ShapeDtypeStruct((N, H * W, Cout), jnp.bfloat16),
        grid_spec=pltpu.PrefetchScalarGridSpec(
            num_scalar_prefetch=0,
            grid=(N, n_tiles),
            in_specs=[
                # main window: padded rows [t*TH, t*TH+TH)
                pl.BlockSpec((1, THW, Cin), lambda n, t: (n, t, 0)),
                # tail window: padded rows [t*TH+TH, t*TH+TH+2)
                pl.BlockSpec((1, 2 * W, Cin),
                             lambda n, t: (n, (t + 1) * (TH // 2), 0)),
                # weights / biases: constant-index blocks, resident across grid
                pl.BlockSpec((Cin, Cmid), lambda n, t: (0, 0)),
                pl.BlockSpec((1, Cmid), lambda n, t: (0, 0)),
                pl.BlockSpec((3, 3 * Cmid, Cout), lambda n, t: (0, 0, 0)),
                pl.BlockSpec((1, Cout), lambda n, t: (0, 0)),
            ],
            out_specs=pl.BlockSpec((1, THW, Cout), lambda n, t: (n, t, 0)),
            scratch_shapes=[
                pltpu.VMEM(((TH + 2) * W, 3 * Cmid), jnp.bfloat16),
            ]),
        compiler_params=pltpu.CompilerParams(
            # batch and H-tile axes are both independent -> megacore friendly
            dimension_semantics=("parallel", "parallel"),
            vmem_limit_bytes=_vmem_limit_bytes(TH, W, Cin, Cmid, Cout)),
    )(x_pad, x_pad, w1, b1, w2, b2)

    return out.reshape(N, H, W, Cout)


def init_params(key, inplanes, planes):
    """Deterministic synthetic parameters matching the nn.Module shapes."""
    c1, c2 = planes
    ks = jax.random.split(key, 10)
    w1_t = 0.1 * jax.random.normal(ks[0], (c1, inplanes, 1, 1), jnp.float32)
    w2_t = 0.1 * jax.random.normal(ks[1], (c2, c1, 3, 3), jnp.float32)
    g1 = 1.0 + 0.1 * jax.random.normal(ks[2], (c1,), jnp.float32)
    beta1 = 0.1 * jax.random.normal(ks[3], (c1,), jnp.float32)
    mu1 = 0.1 * jax.random.normal(ks[4], (c1,), jnp.float32)
    var1 = jnp.abs(1.0 + 0.1 * jax.random.normal(ks[5], (c1,), jnp.float32))
    g2 = 1.0 + 0.1 * jax.random.normal(ks[6], (c2,), jnp.float32)
    beta2 = 0.1 * jax.random.normal(ks[7], (c2,), jnp.float32)
    mu2 = 0.1 * jax.random.normal(ks[8], (c2,), jnp.float32)
    var2 = jnp.abs(1.0 + 0.1 * jax.random.normal(ks[9], (c2,), jnp.float32))
    return (w1_t, g1, beta1, mu1, var1), (w2_t, g2, beta2, mu2, var2)


def fold_params(conv1_p, conv2_p):
    """Fold BN (eval mode) into the conv weights and repack for the kernel."""
    w1_t, g1, beta1, mu1, var1 = conv1_p
    w2_t, g2, beta2, mu2, var2 = conv2_p
    s1 = g1 / jnp.sqrt(var1 + BN_EPS)
    b1 = beta1 - mu1 * s1
    s2 = g2 / jnp.sqrt(var2 + BN_EPS)
    b2 = beta2 - mu2 * s2
    # conv1: (Cmid, Cin, 1, 1) * s1 per out channel -> (Cin, Cmid), bf16.
    w1 = jnp.transpose(w1_t[:, :, 0, 0] * s1[:, None], (1, 0))
    # conv2: (Cout, Cmid, 3, 3) * s2 -> (ky, kx, c, o) -> (3, 3*Cmid, Cout)
    # with packed K index kx*Cmid + c (matches the kernel's channel stack).
    w2 = jnp.transpose(w2_t * s2[:, None, None, None], (2, 3, 1, 0))
    cmid, cout = w2.shape[2], w2.shape[3]
    w2 = w2.reshape(3, 3 * cmid, cout)
    return (w1.astype(jnp.bfloat16), b1.reshape(1, -1),
            w2.astype(jnp.bfloat16), b2.reshape(1, -1))


def reference_forward(x_nhwc, conv1_p, conv2_p):
    """Pure-JAX (XLA) NHWC reference matching the kernel's precision path
    (bf16 activations/weights into the MXU, f32 accumulate/elementwise)."""
    w1_t, g1, beta1, mu1, var1 = conv1_p
    w2_t, g2, beta2, mu2, var2 = conv2_p
    s1 = g1 / jnp.sqrt(var1 + BN_EPS)
    b1 = beta1 - mu1 * s1
    s2 = g2 / jnp.sqrt(var2 + BN_EPS)
    b2 = beta2 - mu2 * s2
    w1_hwio = jnp.transpose(w1_t * s1[:, None, None, None],
                            (2, 3, 1, 0)).astype(jnp.bfloat16)
    w2_hwio = jnp.transpose(w2_t * s2[:, None, None, None],
                            (2, 3, 1, 0)).astype(jnp.bfloat16)
    dn = ("NHWC", "HWIO", "NHWC")
    xb = x_nhwc.astype(jnp.bfloat16)
    h = jax.lax.conv_general_dilated(
        xb, w1_hwio, (1, 1), "VALID",
        dimension_numbers=dn, preferred_element_type=jnp.float32)
    h = h + b1[None, None, None, :]
    h = jnp.where(h >= 0.0, h, LEAKY_SLOPE * h)
    o = jax.lax.conv_general_dilated(
        h.astype(jnp.bfloat16), w2_hwio, (1, 1), ((1, 1), (1, 1)),
        dimension_numbers=dn, preferred_element_type=jnp.float32)
    o = o + b2[None, None, None, :]
    o = jnp.where(o >= 0.0, o, LEAKY_SLOPE * o)
    o = o + xb.astype(jnp.float32)
    return o.astype(jnp.bfloat16)


if __name__ == "__main__":
    key = jax.random.PRNGKey(0)
    k_x, k_p = jax.random.split(key)

    N, inplanes, H, W = 2, 4, 16, 16
    planes = (2, 4)  # planes[1] == inplanes, required for the residual add

    # NHWC activations end-to-end (layout the kernel consumes).
    x = jax.random.normal(k_x, (N, H, W, inplanes), jnp.float32)
    conv1_p, conv2_p = init_params(k_p, inplanes, planes)
    w1, b1, w2, b2 = fold_params(conv1_p, conv2_p)

    # tile_h=8 -> 2 H-tiles per image: exercises the inter-tile 1-row halos.
    out = jax.block_until_ready(basic_block_pallas(x, w1, b1, w2, b2, tile_h=8))
    ref = jax.block_until_ready(reference_forward(x, conv1_p, conv2_p))

    out_f = np.asarray(jnp.asarray(out, jnp.float32))
    ref_f = np.asarray(jnp.asarray(ref, jnp.float32))
    if not np.allclose(out_f, ref_f, rtol=2e-2, atol=2e-2):
        err = float(np.max(np.abs(out_f - ref_f)))
        raise AssertionError(
            f"Pallas BasicBlock mismatch vs XLA reference (max |err| = {err})")

    print("KERNEL_OK")
</pallas_src>

<mosaic_0001>
module attributes {stable_mosaic.version = 11 : i64} {
  func.func @basic_block_kernel(%arg0: i32, %arg1: i32, %arg2: memref<1x128x4xbf16, #tpu.memory_space<vmem>>, %arg3: memref<1x32x4xbf16, #tpu.memory_space<vmem>>, %arg4: memref<4x2xbf16, #tpu.memory_space<vmem>>, %arg5: memref<1x2xf32, #tpu.memory_space<vmem>>, %arg6: memref<3x6x4xbf16, #tpu.memory_space<vmem>>, %arg7: memref<1x4xf32, #tpu.memory_space<vmem>>, %arg8: memref<1x128x4xbf16, #tpu.memory_space<vmem>>, %arg9: memref<160x6xbf16, #tpu.memory_space<vmem>>) attributes {dimension_semantics = [#tpu.dimension_semantics<parallel>, #tpu.dimension_semantics<parallel>], iteration_bounds = array<i64: 2, 2>, scalar_prefetch = 0 : i64, scratch_operands = 1 : i64, tpu.core_type = #tpu.core_type<tc>, window_params = [{transform_indices = @transform_0, window_bounds = array<i64: 1, 128, 4>}, {transform_indices = @transform_1, window_bounds = array<i64: 1, 32, 4>}, {pipeline_mode = #tpu.pipeline_mode<synchronous>, transform_indices = @transform_2, window_bounds = array<i64: 4, 2>}, {pipeline_mode = #tpu.pipeline_mode<synchronous>, transform_indices = @transform_3, window_bounds = array<i64: 1, 2>}, {pipeline_mode = #tpu.pipeline_mode<synchronous>, transform_indices = @transform_4, window_bounds = array<i64: 3, 6, 4>}, {pipeline_mode = #tpu.pipeline_mode<synchronous>, transform_indices = @transform_5, window_bounds = array<i64: 1, 4>}, {transform_indices = @transform_6, window_bounds = array<i64: 1, 128, 4>}]} {
    %c0 = arith.constant 0 : index
    %c0_0 = arith.constant 0 : index
    %c0_1 = arith.constant 0 : index
    %0 = vector.load %arg2[%c0, %c0_0, %c0_1] : memref<1x128x4xbf16, #tpu.memory_space<vmem>>, vector<1x128x4xbf16>
    %1 = vector.shape_cast %0 : vector<1x128x4xbf16> to vector<128x4xbf16>
    %c0_2 = arith.constant 0 : index
    %c0_3 = arith.constant 0 : index
    %2 = vector.load %arg4[%c0_2, %c0_3] : memref<4x2xbf16, #tpu.memory_space<vmem>>, vector<4x2xbf16>
    %c0_4 = arith.constant 0 : index
    %c0_5 = arith.constant 0 : index
    %3 = vector.load %arg5[%c0_4, %c0_5] : memref<1x2xf32, #tpu.memory_space<vmem>>, vector<1x2xf32>
    %cst = arith.constant dense<0.000000e+00> : vector<128x2xf32>
    %4 = tpu.matmul %1, %2, %cst {dimension_numbers = #tpu.dot_dimension_numbers<[1], [0], [0], [1], [0, 0, 1, 1], [], []>} : vector<128x4xbf16>, vector<4x2xbf16>, vector<128x2xf32> -> vector<128x2xf32>
    %5 = vector.broadcast %3 : vector<1x2xf32> to vector<128x2xf32>
    %6 = arith.addf %4, %5 : vector<128x2xf32>
    %cst_6 = arith.constant 0.000000e+00 : f32
    %7 = vector.broadcast %cst_6 : f32 to vector<128x2xf32>
    %8 = arith.cmpf oge, %6, %7 : vector<128x2xf32>
    %cst_7 = arith.constant 1.000000e-01 : f32
    %9 = vector.broadcast %cst_7 : f32 to vector<128x2xf32>
    %10 = arith.mulf %9, %6 : vector<128x2xf32>
    %11 = arith.select %8, %6, %10 : vector<128x2xi1>, vector<128x2xf32>
    %12 = tpu.iota {dimensions = array<i32: 0>} : vector<128x1xi32>
    %c16_i32 = arith.constant 16 : i32
    %c0_i32 = arith.constant 0 : i32
    %13 = arith.cmpi eq, %c16_i32, %c0_i32 : i32
    %c1_i32 = arith.constant 1 : i32
    %14 = arith.select %13, %c1_i32, %c16_i32 : i32
    %15 = vector.broadcast %14 : i32 to vector<128x1xi32>
    %16 = arith.remsi %12, %15 : vector<128x1xi32>
    %c0_i32_8 = arith.constant 0 : i32
    %17 = vector.broadcast %c0_i32_8 : i32 to vector<128x1xi32>
    %18 = arith.cmpi ne, %16, %17 : vector<128x1xi32>
    %c0_i32_9 = arith.constant 0 : i32
    %19 = vector.broadcast %c0_i32_9 : i32 to vector<128x1xi32>
    %20 = arith.cmpi slt, %16, %19 : vector<128x1xi32>
    %c0_i32_10 = arith.constant 0 : i32
    %21 = arith.cmpi slt, %14, %c0_i32_10 : i32
    %22 = vector.broadcast %21 : i1 to vector<128x1xi1>
    %23 = vector.broadcast %22 : vector<128x1xi1> to vector<128x1xi1>
    %24 = arith.xori %20, %23 : vector<128x1xi1>
    %25 = arith.andi %24, %18 : vector<128x1xi1>
    %26 = vector.broadcast %14 : i32 to vector<128x1xi32>
    %27 = arith.addi %16, %26 : vector<128x1xi32>
    %28 = arith.select %25, %27, %16 : vector<128x1xi1>, vector<128x1xi32>
    %c1_i32_11 = arith.constant 1 : i32
    %29 = vector.broadcast %c1_i32_11 : i32 to vector<128x1xi32>
    %30 = arith.cmpi sge, %28, %29 : vector<128x1xi32>
    %c1_i32_12 = arith.constant 1 : i32
    %31 = tpu.dynamic_rotate %11 by %c1_i32_12 dim 0 : vector<128x2xf32>, i32 -> vector<128x2xf32>
    %cst_13 = arith.constant 0.000000e+00 : f32
    %32 = vector.shape_cast %30 : vector<128x1xi1> to vector<128x1xi1>
    %33 = vector.broadcast %32 : vector<128x1xi1> to vector<128x2xi1>
    %34 = vector.broadcast %cst_13 : f32 to vector<128x2xf32>
    %35 = arith.select %33, %31, %34 : vector<128x2xi1>, vector<128x2xf32>
    %c14_i32 = arith.constant 14 : i32
    %36 = vector.broadcast %c14_i32 : i32 to vector<128x1xi32>
    %37 = arith.cmpi sle, %28, %36 : vector<128x1xi32>
    %c127_i32 = arith.constant 127 : i32
    %38 = tpu.dynamic_rotate %11 by %c127_i32 dim 0 : vector<128x2xf32>, i32 -> vector<128x2xf32>
    %cst_14 = arith.constant 0.000000e+00 : f32
    %39 = vector.shape_cast %37 : vector<128x1xi1> to vector<128x1xi1>
    %40 = vector.broadcast %39 : vector<128x1xi1> to vector<128x2xi1>
    %41 = vector.broadcast %cst_14 : f32 to vector<128x2xf32>
    %42 = arith.select %40, %38, %41 : vector<128x2xi1>, vector<128x2xf32>
    %43 = arith.truncf %35 : vector<128x2xf32> to vector<128x2xbf16>
    %44 = arith.truncf %11 : vector<128x2xf32> to vector<128x2xbf16>
    %45 = arith.truncf %42 : vector<128x2xf32> to vector<128x2xbf16>
    %c0_15 = arith.constant 0 : index
    %c0_16 = arith.constant 0 : index
    %c0_17 = arith.constant 0 : index
    %46 = vector.load %arg3[%c0_15, %c0_16, %c0_17] : memref<1x32x4xbf16, #tpu.memory_space<vmem>>, vector<1x32x4xbf16>
    %47 = vector.shape_cast %46 : vector<1x32x4xbf16> to vector<32x4xbf16>
    %c0_18 = arith.constant 0 : index
    %c0_19 = arith.constant 0 : index
    %48 = vector.load %arg4[%c0_18, %c0_19] : memref<4x2xbf16, #tpu.memory_space<vmem>>, vector<4x2xbf16>
    %c0_20 = arith.constant 0 : index
    %c0_21 = arith.constant 0 : index
    %49 = vector.load %arg5[%c0_20, %c0_21] : memref<1x2xf32, #tpu.memory_space<vmem>>, vector<1x2xf32>
    %cst_22 = arith.constant dense<0.000000e+00> : vector<32x2xf32>
    %50 = tpu.matmul %47, %48, %cst_22 {dimension_numbers = #tpu.dot_dimension_numbers<[1], [0], [0], [1], [0, 0, 1, 1], [], []>} : vector<32x4xbf16>, vector<4x2xbf16>, vector<32x2xf32> -> vector<32x2xf32>
    %51 = vector.broadcast %49 : vector<1x2xf32> to vector<32x2xf32>
    %52 = arith.addf %50, %51 : vector<32x2xf32>
    %cst_23 = arith.constant 0.000000e+00 : f32
    %53 = vector.broadcast %cst_23 : f32 to vector<32x2xf32>
    %54 = arith.cmpf oge, %52, %53 : vector<32x2xf32>
    %cst_24 = arith.constant 1.000000e-01 : f32
    %55 = vector.broadcast %cst_24 : f32 to vector<32x2xf32>
    %56 = arith.mulf %55, %52 : vector<32x2xf32>
    %57 = arith.select %54, %52, %56 : vector<32x2xi1>, vector<32x2xf32>
    %58 = tpu.iota {dimensions = array<i32: 0>} : vector<32x1xi32>
    %c16_i32_25 = arith.constant 16 : i32
    %c0_i32_26 = arith.constant 0 : i32
    %59 = arith.cmpi eq, %c16_i32_25, %c0_i32_26 : i32
    %c1_i32_27 = arith.constant 1 : i32
    %60 = arith.select %59, %c1_i32_27, %c16_i32_25 : i32
    %61 = vector.broadcast %60 : i32 to vector<32x1xi32>
    %62 = arith.remsi %58, %61 : vector<32x1xi32>
    %c0_i32_28 = arith.constant 0 : i32
    %63 = vector.broadcast %c0_i32_28 : i32 to vector<32x1xi32>
    %64 = arith.cmpi ne, %62, %63 : vector<32x1xi32>
    %c0_i32_29 = arith.constant 0 : i32
    %65 = vector.broadcast %c0_i32_29 : i32 to vector<32x1xi32>
    %66 = arith.cmpi slt, %62, %65 : vector<32x1xi32>
    %c0_i32_30 = arith.constant 0 : i32
    %67 = arith.cmpi slt, %60, %c0_i32_30 : i32
    %68 = vector.broadcast %67 : i1 to vector<32x1xi1>
    %69 = vector.broadcast %68 : vector<32x1xi1> to vector<32x1xi1>
    %70 = arith.xori %66, %69 : vector<32x1xi1>
    %71 = arith.andi %70, %64 : vector<32x1xi1>
    %72 = vector.broadcast %60 : i32 to vector<32x1xi32>
    %73 = arith.addi %62, %72 : vector<32x1xi32>
    %74 = arith.select %71, %73, %62 : vector<32x1xi1>, vector<32x1xi32>
    %c1_i32_31 = arith.constant 1 : i32
    %75 = vector.broadcast %c1_i32_31 : i32 to vector<32x1xi32>
    %76 = arith.cmpi sge, %74, %75 : vector<32x1xi32>
    %c1_i32_32 = arith.constant 1 : i32
    %77 = tpu.dynamic_rotate %57 by %c1_i32_32 dim 0 : vector<32x2xf32>, i32 -> vector<32x2xf32>
    %cst_33 = arith.constant 0.000000e+00 : f32
    %78 = vector.shape_cast %76 : vector<32x1xi1> to vector<32x1xi1>
    %79 = vector.broadcast %78 : vector<32x1xi1> to vector<32x2xi1>
    %80 = vector.broadcast %cst_33 : f32 to vector<32x2xf32>
    %81 = arith.select %79, %77, %80 : vector<32x2xi1>, vector<32x2xf32>
    %c14_i32_34 = arith.constant 14 : i32
    %82 = vector.broadcast %c14_i32_34 : i32 to vector<32x1xi32>
    %83 = arith.cmpi sle, %74, %82 : vector<32x1xi32>
    %c31_i32 = arith.constant 31 : i32
    %84 = tpu.dynamic_rotate %57 by %c31_i32 dim 0 : vector<32x2xf32>, i32 -> vector<32x2xf32>
    %cst_35 = arith.constant 0.000000e+00 : f32
    %85 = vector.shape_cast %83 : vector<32x1xi1> to vector<32x1xi1>
    %86 = vector.broadcast %85 : vector<32x1xi1> to vector<32x2xi1>
    %87 = vector.broadcast %cst_35 : f32 to vector<32x2xf32>
    %88 = arith.select %86, %84, %87 : vector<32x2xi1>, vector<32x2xf32>
    %89 = arith.truncf %81 : vector<32x2xf32> to vector<32x2xbf16>
    %90 = arith.truncf %57 : vector<32x2xf32> to vector<32x2xbf16>
    %91 = arith.truncf %88 : vector<32x2xf32> to vector<32x2xbf16>
    %c0_36 = arith.constant 0 : index
    %c0_37 = arith.constant 0 : index
    %92 = vector.load %arg9[%c0_36, %c0_37] : memref<160x6xbf16, #tpu.memory_space<vmem>>, vector<128x2xbf16>
    tpu.vector_store %arg9[%c0_36, %c0_37], %43 {strides = array<i32>} : memref<160x6xbf16, #tpu.memory_space<vmem>>, vector<128x2xbf16>,
    %c0_38 = arith.constant 0 : index
    %c2 = arith.constant 2 : index
    %93 = vector.load %arg9[%c0_38, %c2] : memref<160x6xbf16, #tpu.memory_space<vmem>>, vector<128x2xbf16>
    tpu.vector_store %arg9[%c0_38, %c2], %44 {strides = array<i32>} : memref<160x6xbf16, #tpu.memory_space<vmem>>, vector<128x2xbf16>,
    %c0_39 = arith.constant 0 : index
    %c4 = arith.constant 4 : index
    %94 = vector.load %arg9[%c0_39, %c4] : memref<160x6xbf16, #tpu.memory_space<vmem>>, vector<128x2xbf16>
    tpu.vector_store %arg9[%c0_39, %c4], %45 {strides = array<i32>} : memref<160x6xbf16, #tpu.memory_space<vmem>>, vector<128x2xbf16>,
    %c128 = arith.constant 128 : index
    %c0_40 = arith.constant 0 : index
    %95 = vector.load %arg9[%c128, %c0_40] : memref<160x6xbf16, #tpu.memory_space<vmem>>, vector<32x2xbf16>
    tpu.vector_store %arg9[%c128, %c0_40], %89 {strides = array<i32>} : memref<160x6xbf16, #tpu.memory_space<vmem>>, vector<32x2xbf16>,
    %c128_41 = arith.constant 128 : index
    %c2_42 = arith.constant 2 : index
    %96 = vector.load %arg9[%c128_41, %c2_42] : memref<160x6xbf16, #tpu.memory_space<vmem>>, vector<32x2xbf16>
    tpu.vector_store %arg9[%c128_41, %c2_42], %90 {strides = array<i32>} : memref<160x6xbf16, #tpu.memory_space<vmem>>, vector<32x2xbf16>,
    %c128_43 = arith.constant 128 : index
    %c4_44 = arith.constant 4 : index
    %97 = vector.load %arg9[%c128_43, %c4_44] : memref<160x6xbf16, #tpu.memory_space<vmem>>, vector<32x2xbf16>
    tpu.vector_store %arg9[%c128_43, %c4_44], %91 {strides = array<i32>} : memref<160x6xbf16, #tpu.memory_space<vmem>>, vector<32x2xbf16>,
    %c0_i32_45 = arith.constant 0 : i32
    %98 = arith.cmpi eq, %arg1, %c0_i32_45 : i32
    %99 = arith.extui %98 : i1 to i32
    %c0_i32_46 = arith.constant 0 : i32
    %100 = arith.cmpi ne, %99, %c0_i32_46 : i32
    scf.if %100 {
      %cst_77 = arith.constant 0.000000e+00 : bf16
      %137 = vector.broadcast %cst_77 : bf16 to vector<16x6xbf16>
      %c0_78 = arith.constant 0 : index
      %c0_79 = arith.constant 0 : index
      %138 = vector.load %arg9[%c0_78, %c0_79] : memref<160x6xbf16, #tpu.memory_space<vmem>>, vector<16x6xbf16>
      tpu.vector_store %arg9[%c0_78, %c0_79], %137 {strides = array<i32>} : memref<160x6xbf16, #tpu.memory_space<vmem>>, vector<16x6xbf16>,
    } else {
    }
    %c1_i32_47 = arith.constant 1 : i32
    %101 = arith.cmpi eq, %arg1, %c1_i32_47 : i32
    %102 = arith.extui %101 : i1 to i32
    %c0_i32_48 = arith.constant 0 : i32
    %103 = arith.cmpi ne, %102, %c0_i32_48 : i32
    scf.if %103 {
      %cst_77 = arith.constant 0.000000e+00 : bf16
      %137 = vector.broadcast %cst_77 : bf16 to vector<16x6xbf16>
      %c144 = arith.constant 144 : index
      %c0_78 = arith.constant 0 : index
      %138 = vector.load %arg9[%c144, %c0_78] : memref<160x6xbf16, #tpu.memory_space<vmem>>, vector<16x6xbf16>
      tpu.vector_store %arg9[%c144, %c0_78], %137 {strides = array<i32>} : memref<160x6xbf16, #tpu.memory_space<vmem>>, vector<16x6xbf16>,
    } else {
    }
    %c0_49 = arith.constant 0 : index
    %c0_50 = arith.constant 0 : index
    %104 = vector.load %arg9[%c0_49, %c0_50] : memref<160x6xbf16, #tpu.memory_space<vmem>>, vector<128x6xbf16>
    %c0_51 = arith.constant 0 : index
    %c0_52 = arith.constant 0 : index
    %c0_53 = arith.constant 0 : index
    %105 = vector.load %arg6[%c0_51, %c0_52, %c0_53] : memref<3x6x4xbf16, #tpu.memory_space<vmem>>, vector<1x6x4xbf16>
    %106 = vector.shape_cast %105 : vector<1x6x4xbf16> to vector<6x4xbf16>
    %cst_54 = arith.constant dense<0.000000e+00> : vector<128x4xf32>
    %107 = tpu.matmul %104, %106, %cst_54 {dimension_numbers = #tpu.dot_dimension_numbers<[1], [0], [0], [1], [0, 0, 1, 1], [], []>} : vector<128x6xbf16>, vector<6x4xbf16>, vector<128x4xf32> -> vector<128x4xf32>
    %c16 = arith.constant 16 : index
    %c0_55 = arith.constant 0 : index
    %108 = vector.load %arg9[%c16, %c0_55] : memref<160x6xbf16, #tpu.memory_space<vmem>>, vector<128x6xbf16>
    %c1 = arith.constant 1 : index
    %c0_56 = arith.constant 0 : index
    %c0_57 = arith.constant 0 : index
    %109 = vector.load %arg6[%c1, %c0_56, %c0_57] : memref<3x6x4xbf16, #tpu.memory_space<vmem>>, vector<1x6x4xbf16>
    %110 = vector.shape_cast %109 : vector<1x6x4xbf16> to vector<6x4xbf16>
    %cst_58 = arith.constant dense<0.000000e+00> : vector<128x4xf32>
    %111 = tpu.matmul %108, %110, %cst_58 {dimension_numbers = #tpu.dot_dimension_numbers<[1], [0], [0], [1], [0, 0, 1, 1], [], []>} : vector<128x6xbf16>, vector<6x4xbf16>, vector<128x4xf32> -> vector<128x4xf32>
    %112 = arith.addf %107, %111 : vector<128x4xf32>
    %c32 = arith.constant 32 : index
    %c0_59 = arith.constant 0 : index
    %113 = vector.load %arg9[%c32, %c0_59] : memref<160x6xbf16, #tpu.memory_space<vmem>>, vector<128x6xbf16>
    %c2_60 = arith.constant 2 : index
    %c0_61 = arith.constant 0 : index
    %c0_62 = arith.constant 0 : index
    %114 = vector.load %arg6[%c2_60, %c0_61, %c0_62] : memref<3x6x4xbf16, #tpu.memory_space<vmem>>, vector<1x6x4xbf16>
    %115 = vector.shape_cast %114 : vector<1x6x4xbf16> to vector<6x4xbf16>
    %cst_63 = arith.constant dense<0.000000e+00> : vector<128x4xf32>
    %116 = tpu.matmul %113, %115, %cst_63 {dimension_numbers = #tpu.dot_dimension_numbers<[1], [0], [0], [1], [0, 0, 1, 1], [], []>} : vector<128x6xbf16>, vector<6x4xbf16>, vector<128x4xf32> -> vector<128x4xf32>
    %117 = arith.addf %112, %116 : vector<128x4xf32>
    %c0_64 = arith.constant 0 : index
    %c0_65 = arith.constant 0 : index
    %118 = vector.load %arg7[%c0_64, %c0_65] : memref<1x4xf32, #tpu.memory_space<vmem>>, vector<1x4xf32>
    %119 = vector.broadcast %118 : vector<1x4xf32> to vector<128x4xf32>
    %120 = arith.addf %117, %119 : vector<128x4xf32>
    %cst_66 = arith.constant 0.000000e+00 : f32
    %121 = vector.broadcast %cst_66 : f32 to vector<128x4xf32>
    %122 = arith.cmpf oge, %120, %121 : vector<128x4xf32>
    %cst_67 = arith.constant 1.000000e-01 : f32
    %123 = vector.broadcast %cst_67 : f32 to vector<128x4xf32>
    %124 = arith.mulf %123, %120 : vector<128x4xf32>
    %125 = arith.select %122, %120, %124 : vector<128x4xi1>, vector<128x4xf32>
    %c0_68 = arith.constant 0 : index
    %c16_69 = arith.constant 16 : index
    %c0_70 = arith.constant 0 : index
    %126 = vector.load %arg2[%c0_68, %c16_69, %c0_70] : memref<1x128x4xbf16, #tpu.memory_space<vmem>>, vector<1x112x4xbf16>
    %127 = vector.shape_cast %126 : vector<1x112x4xbf16> to vector<112x4xbf16>
    %c0_71 = arith.constant 0 : index
    %c0_72 = arith.constant 0 : index
    %c0_73 = arith.constant 0 : index
    %128 = vector.load %arg3[%c0_71, %c0_72, %c0_73] : memref<1x32x4xbf16, #tpu.memory_space<vmem>>, vector<1x16x4xbf16>
    %129 = vector.shape_cast %128 : vector<1x16x4xbf16> to vector<16x4xbf16>
    %130 = tpu.concatenate %127, %129 in 0 : vector<112x4xbf16>, vector<16x4xbf16> -> vector<128x4xbf16>
    %131 = arith.extf %130 : vector<128x4xbf16> to vector<128x4xf32>
    %132 = arith.addf %125, %131 : vector<128x4xf32>
    %133 = arith.truncf %132 : vector<128x4xf32> to vector<128x4xbf16>
    %c0_74 = arith.constant 0 : index
    %c0_75 = arith.constant 0 : index
    %c0_76 = arith.constant 0 : index
    %134 = vector.load %arg8[%c0_74, %c0_75, %c0_76] : memref<1x128x4xbf16, #tpu.memory_space<vmem>>, vector<1x128x4xbf16>
    %135 = vector.shape_cast %134 : vector<1x128x4xbf16> to vector<128x4xbf16>
    %136 = vector.shape_cast %133 : vector<128x4xbf16> to vector<1x128x4xbf16>
    tpu.vector_store %arg8[%c0_74, %c0_75, %c0_76], %136 {strides = array<i32>} : memref<1x128x4xbf16, #tpu.memory_space<vmem>>, vector<1x128x4xbf16>,
    return
  }
  func.func @transform_0(%arg0: i32, %arg1: i32) -> (i32, i32, i32) {
    %c0_i32 = arith.constant 0 : i32
    %c0_i32_0 = arith.constant 0 : i32
    return %arg0, %arg1, %c0_i32 : i32, i32, i32
  }
  func.func @transform_1(%arg0: i32, %arg1: i32) -> (i32, i32, i32) {
    %c1_i32 = arith.constant 1 : i32
    %0 = arith.addi %arg1, %c1_i32 : i32
    %c4_i32 = arith.constant 4 : i32
    %1 = arith.muli %0, %c4_i32 : i32
    %c0_i32 = arith.constant 0 : i32
    %c0_i32_0 = arith.constant 0 : i32
    return %arg0, %1, %c0_i32 : i32, i32, i32
  }
  func.func @transform_2(%arg0: i32, %arg1: i32) -> (i32, i32) {
    %c0_i32 = arith.constant 0 : i32
    %c0_i32_0 = arith.constant 0 : i32
    %c0_i32_1 = arith.constant 0 : i32
    return %c0_i32, %c0_i32_0 : i32, i32
  }
  func.func @transform_3(%arg0: i32, %arg1: i32) -> (i32, i32) {
    %c0_i32 = arith.constant 0 : i32
    %c0_i32_0 = arith.constant 0 : i32
    %c0_i32_1 = arith.constant 0 : i32
    return %c0_i32, %c0_i32_0 : i32, i32
  }
  func.func @transform_4(%arg0: i32, %arg1: i32) -> (i32, i32, i32) {
    %c0_i32 = arith.constant 0 : i32
    %c0_i32_0 = arith.constant 0 : i32
    %c0_i32_1 = arith.constant 0 : i32
    %c0_i32_2 = arith.constant 0 : i32
    return %c0_i32, %c0_i32_0, %c0_i32_1 : i32, i32, i32
  }
  func.func @transform_5(%arg0: i32, %arg1: i32) -> (i32, i32) {
    %c0_i32 = arith.constant 0 : i32
    %c0_i32_0 = arith.constant 0 : i32
    %c0_i32_1 = arith.constant 0 : i32
    return %c0_i32, %c0_i32_0 : i32, i32
  }
  func.func @transform_6(%arg0: i32, %arg1: i32) -> (i32, i32, i32) {
    %c0_i32 = arith.constant 0 : i32
    %c0_i32_0 = arith.constant 0 : i32
    return %arg0, %arg1, %c0_i32 : i32, i32, i32
  }
}

</mosaic_0001>

<bundles_post_ra>
// kernel: tpu_custom_call.1
= control target key start
LH: loop header
LB: loop body
LE: loop exit
PB: predicated region body
PF: predicated region fallthrough
CT: control target
= control target key end

     0   :  { %s2344_s21 = smov 0   ;;  %s2346_s22 = smov 0   ;;  %s2832_s0 = inlined_call_operand.vmem [shape: bf16[2,288,4], index: 0, kind: input, shape index: {}]   ;;  %s2833_s1 = inlined_call_operand.vmem [shape: bf16[2,288,4], index: 1, kind: input, shape index: {}]   ;;  %s2834_s2 = inlined_call_operand.vmem [shape: bf16[4,2], index: 2, kind: input, shape index: {}]   ;;  %s2835_s3 = inlined_call_operand.vmem [shape: f32[1,2], index: 3, kind: input, shape index: {}]   ;;  %s2836_s4 = inlined_call_operand.vmem [shape: bf16[3,6,4], index: 4, kind: input, shape index: {}]   ;;  %s2837_s5 = inlined_call_operand.vmem [shape: f32[1,4], index: 5, kind: input, shape index: {}]   ;;  %s2838_s6 = inlined_call_operand.vmem [shape: bf16[2,256,4], index: 6, kind: output, shape index: {}]  }
   0x1   :  { %s2348_s23 = smov 0   ;;  %s2350_s24 = smov 0  }
   0x2   :  { %s2352_s25 = smov 0  }
   0x3 LB: > { %s25_s26 = sadd.s32 1, %s2295_s23  ;;  %s28_s27 = sadd.s32 1, %s2299_s24  ;;  %s2303_s25 = sphi %s2352_s25, %s16_s25   ;;  %s2299_s24 = sphi %s2350_s24, %s2850_s24   ;;  %s2295_s23 = sphi %s2348_s23, %s2849_s23   ;;  %s2291_s22 = sphi %s2346_s22, %s2848_s22   ;;  %s2287_s21 = sphi %s2344_s21, %s2847_s21  }
   0x4   : > { %p26_p0 = scmp.ge.s32.totalorder %s25_s26, 2  ;;  %p1984_p1 = scmp.ge.s32.totalorder %s2303_s25, 1 }
   0x5   : > { %p266_p2 = scmp.lt.s32.totalorder %s2303_s25, 5 }
   0x6   : > { %s2852_s26 = smov (%p26_p0, %s25_s26), 0  ;;  %s2854_s27 = smov (!%p26_p0, %s28_s27), %s2299_s24 }
   0x7   : > { %p267_p3 = pnand %p1984_p1, %p266_p2  ;;  %p30_p4 = scmp.ge.s32.totalorder %s2854_s27, 2 }
   0x8   : > { %s1985_s30 = sshll.u32 (!%p267_p3), %s2287_s21, 4  ;;  %p324_p5 = scmp.lt.s32.totalorder (!%p267_p3), %s2291_s22, 1 }
   0x9   : > { %s2856_s27 = smov (%p30_p4, %s2854_s27), 0  ;;  %270 = sbr.rel (%p267_p3) target bundleno = 703 (0x2bf), region = 44 }
   0xa   : > { %p326_p6 = scmp.lt.s32.totalorder (!%p267_p3), %s1985_s30, 35  ;;  %p354_p7 = scmp.lt.s32.totalorder (!%p267_p3), %s1985_s30, 31 }
   0xb   : > { %s2216_s12 = sadd.s32 (!%p267_p3), 16, %s1985_s30  ;;  %p2043_p9 = scmp.ne.s32.totalorder (!%p267_p3), %s2287_s21, 0 }
   0xc   : > { %p342_p8 = scmp.lt.s32.totalorder (!%p267_p3), %s2216_s12, 35 }
   0xe   : > { %v378_v0 = vld [vmem:[%s2834_s2] sm:$0x3]  ;;  %vm448_vm0 = vcmask 1041408   ;;  %s2858_s22 = smov (!%p324_p5, %s2291_s22), 1  ;;  %vm423_vm1 = vcmask 31744   ;;  %s2860_s12 = smov (!%p342_p8, %s2216_s12), 35  ;;  %v549_v16 = vlaneseq }
   0xf   : > { %v450_v1 = vsel %vm448_vm0, %v378_v0, 0  ;;  %s327_s7 = scalar_select %p326_p6, %s1985_s30, 35  ;;  %v2416_v11 = vld [vmem:[%s2835_s3] ss:$0 sm:$0xff]  ;;  %vm1087_vm7 = vcmask 11264  }
  0x10   : > { %459 = vmatpush.bf16.msra.mxu0 %v450_v1  ;;  %2217 = vmatpush.bf16.msra.mxu1 %v450_v1  ;;  %s2218_s8 = smul.u32 36, %s2858_s22  ;;  %s1991_s9 = sshll.u32 %s2858_s22, 5  ;;  %v2427_v22 = vshrl.u32 %v549_v16, 7 }
  0x11   : > { %s355_s10 = scalar_select %p354_p7, %s1985_s30, 31 }
  0x12   : > { %s329_s11 = sadd.s32 %s2218_s8, %s327_s7  ;;  %s345_s28 = sadd.s32 %s2218_s8, %s2860_s12  ;;  %vm887_vm5 = vcmp.lt.s32.totalorder %v2427_v22, 7  ;;  %v551_v27 = vadd.s32 8, %v2427_v22  ;;  %vm790_vm6 = vcmp.lt.s32.totalorder %v2427_v22, 1  ;;  %v552_v31 = vadd.s32 16, %v2427_v22 }
  0x13   : > { %s1986_s13 = sshll.u32 %s329_s11, 2  ;;  %s357_s14 = sadd.s32 %s1991_s9, %s355_s10 }
  0x14   : > { %1027 = vmatpush.bf16.msrb.mxu0 %v450_v1  ;;  %s2383_s17 = scalar_lea.vmem %s2832_s0, %s1986_s13  ;;  %s1992_s18 = sshll.u32 %s357_s14, 2  ;;  %v577_v45 = vand.u32 15, %v551_v27  ;;  %v584_v46 = vand.u32 15, %v552_v31 }
  0x15   : > { %s2388_s22 = scalar_lea.vmem %s2838_s6, %s1992_s18  ;;  %v2180_v2 = vld [vmem:[%s2383_s17] sm:$0xff]  ;;  %s1989_s29 = sshll.u32 %s345_s28, 2  ;;  %v2181_v4 = vld [vmem:[%s2383_s17 + $0x8] sm:$0xff]  ;;  %v2182_v5 = vld [vmem:[%s2383_s17 + $0x10] sm:$0xff] }
  0x16   : > { %2025 = vmatmul.msk.bf16.vlgmr.msra.gmra.mxu0 %vm423_vm1, %v2180_v2  ;;  %s2395_s9 = scalar_lea.vmem %s2833_s1, %s1989_s29  ;;  %v2183_v6 = vld [vmem:[%s2383_s17 + $0x18] sm:$0xff]  ;;  %v2184_v7 = vld [vmem:[%s2383_s17 + $0x20] sm:$0xff]  ;;  %v2185_v8 = vld [vmem:[%s2383_s17 + $0x28] sm:$0xff]  ;;  %s2305_s11 = smov 2   ;;  %vm2458_vm10 = vcmp.le.s32.totalorder %v577_v45, 14  ;;  %vm2462_vm11 = vcmp.ge.s32.totalorder %v584_v46, 1 }
  0x17   : > { %v2189_v3 = vld [vmem:[%s2395_s9 + $0x8] sm:$0xff]  ;;  %v2186_v9 = vld [vmem:[%s2383_s17 + $0x30] sm:$0xff]  ;;  %v2187_v10 = vld [vmem:[%s2383_s17 + $0x38] sm:$0xff]  ;;  %s2306_s12 = smov 4  }
  0x18   : > { %2042 = vmatmul.msk.bf16.vlgmr.msra.gmra.mxu1 %vm423_vm1, %v2189_v3  ;;  %v2188_v12 = vld [vmem:[%s2395_s9] sm:$0xff] }
  0x26   : > { %2026 = vmatmul.msk.bf16.gmra.mxu0 %vm423_vm1, %v2181_v4 }
  0x36   : > { %2027 = vmatmul.msk.bf16.gmra.mxu0 %vm423_vm1, %v2182_v5  ;;  %v553_v5 = vadd.s32 24, %v2427_v22 }
  0x38   : > { %v591_v16 = vand.u32 15, %v553_v5 }
  0x3a   : > { %vm2508_vm14 = vcmp.le.s32.totalorder %v591_v16, 14  ;;  %v558_v16 = vadd.s32 64, %v2427_v22 }
  0x46   : > { %2028 = vmatmul.msk.bf16.gmra.mxu0 %vm423_vm1, %v2183_v6 }
  0x56   : > { %2029 = vmatmul.msk.bf16.gmra.mxu0 %vm423_vm1, %v2184_v7 }
  0x66   : > { %2030 = vmatmul.msk.bf16.gmra.mxu0 %vm423_vm1, %v2185_v8 }
  0x76   : > { %2031 = vmatmul.msk.bf16.gmra.mxu0 %vm423_vm1, %v2186_v9 }
  0x86   : > { %2032 = vmatmul.msk.bf16.gmra.mxu0 %vm423_vm1, %v2187_v10 }
  0x93   : > { %v461_v13 = vpop.f32.mrf.mxu0 }
  0x94   : > { %v462_v14 = vadd.f32 %v2416_v11, %v461_v13 }
  0x95   : > { %v1034_v19 = vpop.f32.mrf.mxu1 }
  0x96   : > { %vm501_vm2 = vcmp.ge.f32.partialorder %v462_v14, 0.0  ;;  %v517_v15 = vmul.f32 0.1, %v462_v14  ;;  %2041 = vmatmul.msk.bf16.vlgmr.msrb.gmra.mxu0 %vm423_vm1, %v2188_v12  ;;  %v1035_v21 = vadd.f32 %v2416_v11, %v1034_v19  ;;  %v554_v12 = vadd.s32 32, %v2427_v22 }
  0x98   : > { %v2421_v17 = vsel %vm501_vm2, %v462_v14, %v517_v15  ;;  %vm1041_vm3 = vcmp.ge.f32.partialorder %v1035_v21, 0.0  ;;  %v1045_v24 = vmul.f32 0.1, %v1035_v21 }
  0x99   : > { %v968_v18 = vpack.c.bf16 %v2421_v17, %v2421_v17  ;;  %v774_v29 = vrot.slane %v2421_v17, 7  ;;  %v871_v33 = vrot.slane %v2421_v17, 1 }
  0x9a   : > { %v2431_v26 = vsel %vm1041_vm3, %v1035_v21, %v1045_v24  ;;  %v598_v24 = vand.u32 15, %v554_v12 }
  0x9b   : > { %v463_v20 = vpop.f32.mrf.mxu0  ;;  %1120 = vrot.lane.b32.xlu0 %v968_v18, %s2305_s11  ;;  %v1081_v30 = vpack.c.bf16 %v2431_v26, %v2431_v26  ;;  %v1053_v55 = vrot.slane %v2431_v26, 7  ;;  %v1065_v56 = vrot.slane %v2431_v26, 1 }
  0x9c   : > { %v464_v23 = vadd.f32 %v2416_v11, %v463_v20  ;;  %vm762_vm15 = vcmp.ge.s32.totalorder %v598_v24, 1  ;;  %v557_v24 = vadd.s32 56, %v2427_v22 }
  0x9d   : > { %v1036_v36 = vpop.f32.mrf.mxu1  ;;  %1278 = vrot.lane.b32.xlu2 %v1081_v30, %s2305_s11 }
  0x9e   : > { %vm502_vm4 = vcmp.ge.f32.partialorder %v464_v23, 0.0  ;;  %v518_v25 = vmul.f32 0.1, %v464_v23  ;;  %v1037_v38 = vadd.f32 %v2416_v11, %v1036_v36 }
  0xa0   : > { %v534_v28 = vsel %vm502_vm4, %v464_v23, %v518_v25  ;;  %vm1042_vm8 = vcmp.ge.f32.partialorder %v1037_v38, 0.0  ;;  %v1046_v44 = vmul.f32 0.1, %v1037_v38 }
  0xa1   : > { %v775_v32 = vrot.slane %v534_v28, 7  ;;  %v969_v34 = vpack.c.bf16 %v534_v28, %v534_v28  ;;  %v872_v35 = vrot.slane %v534_v28, 1 }
  0xa2   : > { %v2454_v48 = vsel %vm1042_vm8, %v1037_v38, %v1046_v44  ;;  %v556_v44 = vadd.s32 48, %v2427_v22 }
  0xa3   : > { %v466_v37 = vpop.f32.mrf.mxu0  ;;  %1122 = vrot.lane.b32.xlu0 %v969_v34, %s2305_s11  ;;  %v902_v39 = vsel %vm887_vm5, %v871_v33, %v872_v35  ;;  %v805_v40 = vsel %vm790_vm6, %v774_v29, %v775_v32  ;;  %v1082_v50 = vpack.c.bf16 %v2454_v48, %v2454_v48  ;;  %v1054_v57 = vrot.slane %v2454_v48, 7 }
  0xa4   : > { %v467_v41 = vadd.f32 %v2416_v11, %v466_v37  ;;  %v984_v42 = vpack.c.bf16 %v902_v39, %v902_v39  ;;  %v953_v43 = vpack.c.bf16 %v805_v40, %v805_v40  ;;  %v1066_v58 = vrot.slane %v2454_v48, 1 }
  0xa5   : > { %v1055_v8 = vsel %vm790_vm6, %v1053_v55, %v1054_v57 }
  0xa6   : > { %vm503_vm9 = vcmp.ge.f32.partialorder %v467_v41, 0.0  ;;  %v519_v47 = vmul.f32 0.1, %v467_v41  ;;  %1201 = vrot.lane.b32.xlu1 %v984_v42, %s2306_s12  ;;  %1089 = vst.msk [vmem:[#allocation2 + $0x4] sm:$0xf] %vm1087_vm7, %v953_v43  ;;  %v2490_v7 = vsel %vm887_vm5, %v1065_v56, %v1066_v58  ;;  %v1078_v13 = vpack.c.bf16 %v1055_v8, %v1055_v8 }
  0xa8   : > { %v535_v49 = vsel %vm503_vm9, %v467_v41, %v519_v47  ;;  %1269 = vst.msk [vmem:[#allocation2 + $0x4c] sm:$0xf] %vm1087_vm7, %v1078_v13 }
  0xa9   : > { %v776_v51 = vrot.slane %v535_v49, 7  ;;  %v873_v52 = vrot.slane %v535_v49, 1  ;;  %v970_v63 = vpack.c.bf16 %v535_v49, %v535_v49 }
  0xab   : > { %v468_v59 = vpop.f32.mrf.mxu0  ;;  %1280 = vrot.lane.b32.xlu0 %v1082_v50, %s2305_s11  ;;  %v901_v60 = vsel %vm887_vm5, %v872_v35, %v873_v52  ;;  %v804_v61 = vsel %vm790_vm6, %v775_v32, %v776_v51  ;;  %v555_v50 = vadd.s32 40, %v2427_v22 }
  0xac   : > { %v469_v62 = vadd.f32 %v2416_v11, %v468_v59  ;;  %v937_v0 = vsel %vm2458_vm10, %v901_v60, 0.0  ;;  %v841_v1 = vsel %vm2462_vm11, %v804_v61, 0.0  ;;  %v612_v60 = vand.u32 15, %v556_v44 }
  0xad   : > { %v985_v2 = vpack.c.bf16 %v937_v0, %v937_v0  ;;  %v954_v3 = vpack.c.bf16 %v841_v1, %v841_v1 }
  0xae   : > { %vm504_vm12 = vcmp.ge.f32.partialorder %v469_v62, 0.0  ;;  %v520_v4 = vmul.f32 0.1, %v469_v62  ;;  %1124 = vrot.lane.b32.xlu1 %v970_v63, %s2305_s11  ;;  %v605_v63 = vand.u32 15, %v555_v50  ;;  %vm764_vm2 = vcmp.ge.s32.totalorder %v612_v60, 1 }
  0xaf   : > { %1203 = vrot.lane.b32.xlu2 %v985_v2, %s2306_s12  ;;  %1090 = vst.msk [vmem:[#allocation2 + $0x8] sm:$0xf] %vm1087_vm7, %v954_v3 }
  0xb0   : > { %v536_v6 = vsel %vm504_vm12, %v469_v62, %v520_v4  ;;  %vm860_vm3 = vcmp.le.s32.totalorder %v605_v63, 14  ;;  %v559_v63 = vadd.s32 72, %v2427_v22 }
  0xb1   : > { %v777_v9 = vrot.slane %v536_v6, 7  ;;  %v874_v10 = vrot.slane %v536_v6, 1  ;;  %v971_v21 = vpack.c.bf16 %v536_v6, %v536_v6 }
  0xb3   : > { %v471_v14 = vpop.f32.mrf.mxu0  ;;  %v900_v15 = vsel %vm887_vm5, %v873_v52, %v874_v10  ;;  %v803_v18 = vsel %vm790_vm6, %v776_v51, %v777_v9 }
  0xb4   : > { %v472_v19 = vadd.f32 %v2416_v11, %v471_v14  ;;  %v986_v20 = vpack.c.bf16 %v900_v15, %v900_v15  ;;  %v955_v23 = vpack.c.bf16 %v803_v18, %v803_v18 }
  0xb6   : > { %vm505_vm13 = vcmp.ge.f32.partialorder %v472_v19, 0.0  ;;  %v521_v25 = vmul.f32 0.1, %v472_v19  ;;  %1205 = vrot.lane.b32.xlu0 %v986_v20, %s2306_s12  ;;  %1126 = vrot.lane.b32.xlu1 %v971_v21, %s2305_s11  ;;  %1091 = vst.msk [vmem:[#allocation2 + $0xc] sm:$0xf] %vm1087_vm7, %v955_v23 }
  0xb8   : > { %v537_v27 = vsel %vm505_vm13, %v472_v19, %v521_v25 }
  0xb9   : > { %v778_v30 = vrot.slane %v537_v27, 7  ;;  %v875_v31 = vrot.slane %v537_v27, 1  ;;  %v972_v32 = vpack.c.bf16 %v537_v27, %v537_v27 }
  0xbb   : > { %v473_v34 = vpop.f32.mrf.mxu0  ;;  %1128 = vrot.lane.b32.xlu2 %v972_v32, %s2305_s11  ;;  %v899_v35 = vsel %vm887_vm5, %v874_v10, %v875_v31  ;;  %v802_v36 = vsel %vm790_vm6, %v777_v9, %v778_v30 }
  0xbc   : > { %v474_v37 = vadd.f32 %v2416_v11, %v473_v34  ;;  %v939_v38 = vsel %vm2508_vm14, %v899_v35, 0.0  ;;  %v843_v39 = vsel %vm762_vm15, %v802_v36, 0.0  ;;  %v619_v35 = vand.u32 15, %v557_v24 }
  0xbd   : > { %v987_v40 = vpack.c.bf16 %v939_v38, %v939_v38  ;;  %v956_v41 = vpack.c.bf16 %v843_v39, %v843_v39 }
  0xbe   : > { %vm506_vm0 = vcmp.ge.f32.partialorder %v474_v37, 0.0  ;;  %v522_v42 = vmul.f32 0.1, %v474_v37  ;;  %vm862_vm12 = vcmp.le.s32.totalorder %v619_v35, 14 }
  0xbf   : > { %1207 = vrot.lane.b32.xlu1 %v987_v40, %s2306_s12  ;;  %1092 = vst.msk [vmem:[#allocation2 + $0x10] sm:$0xf] %vm1087_vm7, %v956_v41 }
  0xc0   : > { %v538_v43 = vsel %vm506_vm0, %v474_v37, %v522_v42 }
  0xc1   : > { %v779_v45 = vrot.slane %v538_v43, 7  ;;  %v973_v46 = vpack.c.bf16 %v538_v43, %v538_v43  ;;  %v876_v47 = vrot.slane %v538_v43, 1 }
  0xc3   : > { %v476_v49 = vpop.f32.mrf.mxu0  ;;  %1130 = vrot.lane.b32.xlu2 %v973_v46, %s2305_s11  ;;  %v801_v51 = vsel %vm790_vm6, %v778_v30, %v779_v45  ;;  %v898_v62 = vsel %vm887_vm5, %v875_v31, %v876_v47  ;;  %v626_v30 = vand.u32 15, %v558_v16 }
  0xc4   : > { %v477_v52 = vadd.f32 %v2416_v11, %v476_v49  ;;  %v957_v59 = vpack.c.bf16 %v801_v51, %v801_v51  ;;  %v988_v3 = vpack.c.bf16 %v898_v62, %v898_v62  ;;  %v560_v51 = vadd.s32 80, %v2427_v22 }
  0xc5   : > { %vm766_vm9 = vcmp.ge.s32.totalorder %v626_v30, 1 }
  0xc6   : > { %vm507_vm1 = vcmp.ge.f32.partialorder %v477_v52, 0.0  ;;  %v523_v61 = vmul.f32 0.1, %v477_v52  ;;  %1093 = vst.msk [vmem:[#allocation2 + $0x14] sm:$0xf] %vm1087_vm7, %v957_v59 }
  0xc8   : > { %v539_v0 = vsel %vm507_vm1, %v477_v52, %v523_v61 }
  0xc9   : > { %v780_v1 = vrot.slane %v539_v0, 7  ;;  %v877_v2 = vrot.slane %v539_v0, 1  ;;  %v974_v4 = vpack.c.bf16 %v539_v0, %v539_v0 }
  0xcb   : > { %v478_v5 = vpop.f32.mrf.mxu0  ;;  %1209 = vrot.lane.b32.xlu2 %v988_v3, %s2306_s12  ;;  %1132 = vrot.lane.b32.xlu0 %v974_v4, %s2305_s11  ;;  %v897_v6 = vsel %vm887_vm5, %v876_v47, %v877_v2  ;;  %v800_v8 = vsel %vm790_vm6, %v779_v45, %v780_v1  ;;  %v640_v3 = vand.u32 15, %v560_v51 }
  0xcc   : > { %v479_v9 = vadd.f32 %v2416_v11, %v478_v5  ;;  %v845_v10 = vsel %vm764_vm2, %v800_v8, 0.0  ;;  %v941_v14 = vsel %vm860_vm3, %v897_v6, 0.0  ;;  %v633_v6 = vand.u32 15, %v559_v63 }
  0xcd   : > { %v958_v12 = vpack.c.bf16 %v845_v10, %v845_v10  ;;  %v989_v19 = vpack.c.bf16 %v941_v14, %v941_v14  ;;  %vm768_vm0 = vcmp.ge.s32.totalorder %v640_v3, 1 }
  0xce   : > { %vm508_vm4 = vcmp.ge.f32.partialorder %v479_v9, 0.0  ;;  %v524_v13 = vmul.f32 0.1, %v479_v9  ;;  %vm864_vm1 = vcmp.le.s32.totalorder %v633_v6, 14 }
  0xcf   : > { %1094 = vst.msk [vmem:[#allocation2 + $0x18] sm:$0xf] %vm1087_vm7, %v958_v12 }
  0xd0   : > { %v540_v15 = vsel %vm508_vm4, %v479_v9, %v524_v13 }
  0xd1   : > { %v781_v18 = vrot.slane %v540_v15, 7  ;;  %v975_v20 = vpack.c.bf16 %v540_v15, %v540_v15  ;;  %v878_v21 = vrot.slane %v540_v15, 1 }
  0xd3   : > { %v481_v23 = vpop.f32.mrf.mxu0  ;;  %1211 = vrot.lane.b32.xlu0 %v989_v19, %s2306_s12  ;;  %1134 = vrot.lane.b32.xlu1 %v975_v20, %s2305_s11  ;;  %v799_v25 = vsel %vm790_vm6, %v780_v1, %v781_v18  ;;  %v896_v34 = vsel %vm887_vm5, %v877_v2, %v878_v21 }
  0xd4   : > { %v482_v27 = vadd.f32 %v2416_v11, %v481_v23  ;;  %v959_v31 = vpack.c.bf16 %v799_v25, %v799_v25  ;;  %v990_v40 = vpack.c.bf16 %v896_v34, %v896_v34  ;;  %v561_v25 = vadd.s32 88, %v2427_v22 }
  0xd6   : > { %vm509_vm8 = vcmp.ge.f32.partialorder %v482_v27, 0.0  ;;  %v525_v32 = vmul.f32 0.1, %v482_v27  ;;  %1095 = vst.msk [vmem:[#allocation2 + $0x1c] sm:$0xf] %vm1087_vm7, %v959_v31 }
  0xd8   : > { %v541_v36 = vsel %vm509_vm8, %v482_v27, %v525_v32  ;;  %v562_v27 = vadd.s32 96, %v2427_v22 }
  0xd9   : > { %v782_v37 = vrot.slane %v541_v36, 7  ;;  %v879_v38 = vrot.slane %v541_v36, 1  ;;  %v976_v39 = vpack.c.bf16 %v541_v36, %v541_v36 }
  0xdb   : > { %v483_v41 = vpop.f32.mrf.mxu0  ;;  %1136 = vrot.lane.b32.xlu2 %v976_v39, %s2305_s11  ;;  %1213 = vrot.lane.b32.xlu1 %v990_v40, %s2306_s12  ;;  %v895_v42 = vsel %vm887_vm5, %v878_v21, %v879_v38  ;;  %v798_v43 = vsel %vm790_vm6, %v781_v18, %v782_v37  ;;  %v654_v40 = vand.u32 15, %v562_v27 }
  0xdc   : > { %v484_v44 = vadd.f32 %v2416_v11, %v483_v41  ;;  %v847_v45 = vsel %vm766_vm9, %v798_v43, 0.0  ;;  %v943_v49 = vsel %vm862_vm12, %v895_v42, 0.0 }
  0xdd   : > { %v960_v46 = vpack.c.bf16 %v847_v45, %v847_v45  ;;  %v991_v59 = vpack.c.bf16 %v943_v49, %v943_v49  ;;  %vm770_vm8 = vcmp.ge.s32.totalorder %v654_v40, 1 }
  0xde   : > { %vm510_vm13 = vcmp.ge.f32.partialorder %v484_v44, 0.0  ;;  %v526_v47 = vmul.f32 0.1, %v484_v44 }
  0xdf   : > { %1096 = vst.msk [vmem:[#allocation2 + $0x20] sm:$0xf] %vm1087_vm7, %v960_v46 }
  0xe0   : > { %v542_v50 = vsel %vm510_vm13, %v484_v44, %v526_v47 }
  0xe1   : > { %v783_v52 = vrot.slane %v542_v50, 7  ;;  %v977_v60 = vpack.c.bf16 %v542_v50, %v542_v50  ;;  %v880_v61 = vrot.slane %v542_v50, 1 }
  0xe3   : > { %v486_v62 = vpop.f32.mrf.mxu0  ;;  %1215 = vrot.lane.b32.xlu2 %v991_v59, %s2306_s12  ;;  %1138 = vrot.lane.b32.xlu0 %v977_v60, %s2305_s11  ;;  %v797_v0 = vsel %vm790_vm6, %v782_v37, %v783_v52  ;;  %v894_v5 = vsel %vm887_vm5, %v879_v38, %v880_v61  ;;  %v647_v38 = vand.u32 15, %v561_v25 }
  0xe4   : > { %v487_v1 = vadd.f32 %v2416_v11, %v486_v62  ;;  %v961_v2 = vpack.c.bf16 %v797_v0, %v797_v0  ;;  %v992_v12 = vpack.c.bf16 %v894_v5, %v894_v5 }
  0xe5   : > { %vm866_vm4 = vcmp.le.s32.totalorder %v647_v38, 14 }
  0xe6   : > { %vm511_vm15 = vcmp.ge.f32.partialorder %v487_v1, 0.0  ;;  %v527_v4 = vmul.f32 0.1, %v487_v1  ;;  %1097 = vst.msk [vmem:[#allocation2 + $0x24] sm:$0xf] %vm1087_vm7, %v961_v2 }
  0xe8   : > { %v543_v8 = vsel %vm511_vm15, %v487_v1, %v527_v4  ;;  %v563_v1 = vadd.s32 104, %v2427_v22  ;;  %v564_v4 = vadd.s32 112, %v2427_v22 }
  0xe9   : > { %v784_v9 = vrot.slane %v543_v8, 7  ;;  %v881_v10 = vrot.slane %v543_v8, 1  ;;  %v978_v13 = vpack.c.bf16 %v543_v8, %v543_v8 }
  0xeb   : > { %v488_v14 = vpop.f32.mrf.mxu0  ;;  %1217 = vrot.lane.b32.xlu0 %v992_v12, %s2306_s12  ;;  %1140 = vrot.lane.b32.xlu1 %v978_v13, %s2305_s11  ;;  %v893_v15 = vsel %vm887_vm5, %v880_v61, %v881_v10  ;;  %v796_v16 = vsel %vm790_vm6, %v783_v52, %v784_v9  ;;  %v661_v13 = vand.u32 15, %v563_v1 }
  0xec   : > { %v489_v18 = vadd.f32 %v2416_v11, %v488_v14  ;;  %v849_v19 = vsel %vm768_vm0, %v796_v16, 0.0  ;;  %v945_v23 = vsel %vm864_vm1, %v893_v15, 0.0  ;;  %v668_v16 = vand.u32 15, %v564_v4 }
  0xed   : > { %v962_v20 = vpack.c.bf16 %v849_v19, %v849_v19  ;;  %v993_v32 = vpack.c.bf16 %v945_v23, %v945_v23  ;;  %vm868_vm13 = vcmp.le.s32.totalorder %v661_v13, 14  ;;  %v565_v23 = vadd.s32 120, %v2427_v22 }
  0xee   : > { %vm512_vm2 = vcmp.ge.f32.partialorder %v489_v18, 0.0  ;;  %v528_v21 = vmul.f32 0.1, %v489_v18  ;;  %vm772_vm15 = vcmp.ge.s32.totalorder %v668_v16, 1 }
  0xef   : > { %1098 = vst.msk [vmem:[#allocation2 + $0x28] sm:$0xf] %vm1087_vm7, %v962_v20 }
  0xf0   : > { %v544_v24 = vsel %vm512_vm2, %v489_v18, %v528_v21 }
  0xf1   : > { %v785_v30 = vrot.slane %v544_v24, 7  ;;  %v979_v31 = vpack.c.bf16 %v544_v24, %v544_v24  ;;  %v882_v34 = vrot.slane %v544_v24, 1 }
  0xf3   : > { %v491_v35 = vpop.f32.mrf.mxu0  ;;  %1142 = vrot.lane.b32.xlu2 %v979_v31, %s2305_s11  ;;  %1219 = vrot.lane.b32.xlu1 %v993_v32, %s2306_s12  ;;  %v795_v36 = vsel %vm790_vm6, %v784_v9, %v785_v30  ;;  %v892_v42 = vsel %vm887_vm5, %v881_v10, %v882_v34 }
  0xf4   : > { %v492_v37 = vadd.f32 %v2416_v11, %v491_v35  ;;  %v963_v39 = vpack.c.bf16 %v795_v36, %v795_v36  ;;  %v994_v46 = vpack.c.bf16 %v892_v42, %v892_v42  ;;  %v570_v36 = vand.u32 15, %v2427_v22 }
  0xf6   : > { %vm513_vm3 = vcmp.ge.f32.partialorder %v492_v37, 0.0  ;;  %v529_v41 = vmul.f32 0.1, %v492_v37  ;;  %1099 = vst.msk [vmem:[#allocation2 + $0x2c] sm:$0xf] %vm1087_vm7, %v963_v39  ;;  %v675_v39 = vand.u32 15, %v565_v23 }
  0xf7   : > { %v2596_v5 = vpop.permute.xlu2 %1278  ;;  %vm2616_vm1 = vcmp.ge.s32.totalorder %v570_v36, 1 }
  0xf8   : > { %v545_v43 = vsel %vm513_vm3, %v492_v37, %v529_v41  ;;  %vm870_vm2 = vcmp.le.s32.totalorder %v675_v39, 14  ;;  %vm1168_vm3 = vcmask 27664  }
  0xf9   : > { %v786_v44 = vrot.slane %v545_v43, 7  ;;  %v883_v45 = vrot.slane %v545_v43, 1  ;;  %v980_v47 = vpack.c.bf16 %v545_v43, %v545_v43 }
  0xfb   : > { %v493_v49 = vpop.f32.mrf.mxu0  ;;  %1221 = vrot.lane.b32.xlu2 %v994_v46, %s2306_s12  ;;  %1144 = vrot.lane.b32.xlu0 %v980_v47, %s2305_s11  ;;  %v891_v50 = vsel %vm887_vm5, %v882_v34, %v883_v45  ;;  %v794_v51 = vsel %vm790_vm6, %v785_v30, %v786_v44 }
  0xfc   : > { %v494_v52 = vadd.f32 %v2416_v11, %v493_v49  ;;  %v947_v59 = vsel %vm866_vm4, %v891_v50, 0.0  ;;  %v851_v60 = vsel %vm770_vm8, %v794_v51, 0.0  ;;  %vm1249_vm8 = vcmask 44064  }
  0xfd   : > { %v995_v61 = vpack.c.bf16 %v947_v59, %v947_v59  ;;  %v964_v62 = vpack.c.bf16 %v851_v60, %v851_v60 }
  0xfe   : > { %vm514_vm9 = vcmp.ge.f32.partialorder %v494_v52, 0.0  ;;  %v530_v63 = vmul.f32 0.1, %v494_v52 }
  0xff   : > { %1223 = vrot.lane.b32.xlu1 %v995_v61, %s2306_s12  ;;  %1100 = vst.msk [vmem:[#allocation2 + $0x30] sm:$0xf] %vm1087_vm7, %v964_v62 }
 0x100   : > { %v546_v0 = vsel %vm514_vm9, %v494_v52, %v530_v63 }
 0x101   : > { %v787_v2 = vrot.slane %v546_v0, 7  ;;  %v884_v3 = vrot.slane %v546_v0, 1  ;;  %v981_v15 = vpack.c.bf16 %v546_v0, %v546_v0 }
 0x103   : > { %v496_v6 = vpop.f32.mrf.mxu0  ;;  %v890_v8 = vsel %vm887_vm5, %v883_v45, %v884_v3  ;;  %v793_v9 = vsel %vm790_vm6, %v786_v44, %v787_v2 }
 0x104   : > { %v497_v10 = vadd.f32 %v2416_v11, %v496_v6  ;;  %v996_v12 = vpack.c.bf16 %v890_v8, %v890_v8  ;;  %v965_v14 = vpack.c.bf16 %v793_v9, %v793_v9 }
 0x106   : > { %vm515_vm12 = vcmp.ge.f32.partialorder %v497_v10, 0.0  ;;  %v531_v18 = vmul.f32 0.1, %v497_v10  ;;  %1225 = vrot.lane.b32.xlu2 %v996_v12, %s2306_s12  ;;  %1101 = vst.msk [vmem:[#allocation2 + $0x34] sm:$0xf] %vm1087_vm7, %v965_v14  ;;  %v1085_v14 = vpack.c.bf16 %v2490_v7, %v2490_v7 }
 0x107   : > { %1146 = vrot.lane.b32.xlu1 %v981_v15, %s2305_s11 }
 0x108   : > { %v547_v19 = vsel %vm515_vm12, %v497_v10, %v531_v18 }
 0x109   : > { %v788_v20 = vrot.slane %v547_v19, 7  ;;  %v885_v21 = vrot.slane %v547_v19, 1  ;;  %v982_v31 = vpack.c.bf16 %v547_v19, %v547_v19  ;;  %v1204_v35 = vpop.permute.xlu2 %1203 }
 0x10b   : > { %v498_v24 = vpop.f32.mrf.mxu0  ;;  %v889_v25 = vsel %vm887_vm5, %v884_v3, %v885_v21  ;;  %v792_v27 = vsel %vm790_vm6, %v787_v2, %v788_v20 }
 0x10c   : > { %v499_v30 = vadd.f32 %v2416_v11, %v498_v24  ;;  %v949_v32 = vsel %vm868_vm13, %v889_v25, 0.0  ;;  %v853_v34 = vsel %vm772_vm15, %v792_v27, 0.0 }
 0x10d   : > { %v1121_v37 = vpop.permute.xlu0 %1120  ;;  %v997_v38 = vpack.c.bf16 %v949_v32, %v949_v32  ;;  %v966_v40 = vpack.c.bf16 %v853_v34, %v853_v34 }
 0x10e   : > { %vm516_vm0 = vcmp.ge.f32.partialorder %v499_v30, 0.0  ;;  %v532_v41 = vmul.f32 0.1, %v499_v30  ;;  %1148 = vrot.lane.b32.xlu2 %v982_v31, %s2305_s11 }
 0x10f   : > { %1227 = vrot.lane.b32.xlu0 %v997_v38, %s2306_s12  ;;  %1102 = vst.msk [vmem:[#allocation2 + $0x38] sm:$0xf] %vm1087_vm7, %v966_v40 }
 0x110   : > { %v548_v42 = vsel %vm516_vm0, %v499_v30, %v532_v41 }
 0x111   : > { %v789_v43 = vrot.slane %v548_v42, 7  ;;  %v886_v44 = vrot.slane %v548_v42, 1  ;;  %v983_v63 = vpack.c.bf16 %v548_v42, %v548_v42 }
 0x113   : > { %v806_v46 = vsel %vm790_vm6, %v789_v43, %v774_v29  ;;  %v1029_v47 = vpop.f32.mrf.mxu0  ;;  %v888_v49 = vsel %vm887_vm5, %v885_v21, %v886_v44  ;;  %v903_v50 = vsel %vm887_vm5, %v886_v44, %v871_v33  ;;  %v791_v0 = vsel %vm790_vm6, %v788_v20, %v789_v43 }
 0x114   : > { %v839_v51 = vsel %vm2616_vm1, %v806_v46, 0.0  ;;  %v1030_v52 = vadd.f32 %v2416_v11, %v1029_v47  ;;  %v998_v59 = vpack.c.bf16 %v888_v49, %v888_v49  ;;  %v951_v60 = vsel %vm870_vm2, %v903_v50, 0.0 }
 0x115   : > { %v952_v61 = vpack.c.bf16 %v839_v51, %v839_v51  ;;  %v1129_v62 = vpop.permute.xlu2 %1128  ;;  %v999_v29 = vpack.c.bf16 %v951_v60, %v951_v60  ;;  %v1123_v17 = vpop.permute.xlu0 %1122  ;;  %v967_v3 = vpack.c.bf16 %v791_v0, %v791_v0 }
 0x116   : > { %vm1039_vm4 = vcmp.ge.f32.partialorder %v1030_v52, 0.0  ;;  %v1043_v1 = vmul.f32 0.1, %v1030_v52  ;;  %1173 = vst.msk [vmem:[#allocation2 + $0x10] sm:$0xf] %vm1168_vm3, %v1129_v62  ;;  %1229 = vrot.lane.b32.xlu1 %v998_v59, %s2306_s12 }
 0x117   : > { %1088 = vst.msk [vmem:[#allocation2] sm:$0xf] %vm1087_vm7, %v952_v61  ;;  %1150 = vrot.lane.b32.xlu0 %v983_v63, %s2305_s11  ;;  %1231 = vrot.lane.b32.xlu2 %v999_v29, %s2306_s12 }
 0x118   : > { %1169 = vst.msk [vmem:[#allocation2] sm:$0xf] %vm1168_vm3, %v1121_v37  ;;  %v1047_v33 = vsel %vm1039_vm4, %v1030_v52, %v1043_v1  ;;  %v1202_v2 = vpop.permute.xlu1 %1201 }
 0x119   : > { %v1051_v4 = vrot.slane %v1047_v33, 7  ;;  %1170 = vst.msk [vmem:[#allocation2 + $0x4] sm:$0xf] %vm1168_vm3, %v1123_v17  ;;  %v1079_v13 = vpack.c.bf16 %v1047_v33, %v1047_v33  ;;  %v1063_v19 = vrot.slane %v1047_v33, 1 }
 0x11a   : > { %1251 = vst.msk [vmem:[#allocation2 + $0x4] sm:$0xf] %vm1249_vm8, %v1204_v35 }
 0x11b   : > { %1250 = vst.msk [vmem:[#allocation2] sm:$0xf] %vm1249_vm8, %v1202_v2  ;;  %v1031_v6 = vpop.f32.mrf.mxu0  ;;  %v1058_v8 = vsel %vm790_vm6, %v1054_v57, %v1051_v4  ;;  %v1070_v26 = vsel %vm887_vm5, %v1066_v58, %v1063_v19 }
 0x11c   : > { %v1032_v9 = vadd.f32 %v2416_v11, %v1031_v6  ;;  %1103 = vst.msk [vmem:[#allocation2 + $0x3c] sm:$0xf] %vm1087_vm7, %v967_v3  ;;  %v1059_v10 = vsel %vm2616_vm1, %v1058_v8, 0.0  ;;  %v1074_v53 = vsel %vm2508_vm14, %v1070_v26, 0.0 }
 0x11d   : > { %v1131_v12 = vpop.permute.xlu2 %1130  ;;  %v1075_v15 = vpack.c.bf16 %v1059_v10, %v1059_v10  ;;  %v1281_v18 = vpop.permute.xlu0 %1280  ;;  %v1086_v22 = vpack.c.bf16 %v1074_v53, %v1074_v53 }
 0x11e   : > { %vm1040_vm9 = vcmp.ge.f32.partialorder %v1032_v9, 0.0  ;;  %v1044_v16 = vmul.f32 0.1, %v1032_v9  ;;  %1174 = vst.msk [vmem:[#allocation2 + $0x14] sm:$0xf] %vm1168_vm3, %v1131_v12 }
 0x11f   : > { %1274 = vrot.lane.b32.xlu0 %v1079_v13, %s2305_s11  ;;  %1298 = vrot.lane.b32.xlu2 %v1085_v14, %s2306_s12  ;;  %1289 = vst.msk [vmem:[#allocation2 + $0x4c] sm:$0xf] %vm1168_vm3, %v1281_v18 }
 0x120   : > { %v1048_v11 = vsel %vm1040_vm9, %v1032_v9, %v1044_v16  ;;  %v1125_v57 = vpop.permute.xlu1 %1124  ;;  %1266 = vst.msk [vmem:[#allocation2 + $0x40] sm:$0xf] %vm1087_vm7, %v1075_v15 }
 0x121   : > { %v1052_v20 = vrot.slane %v1048_v11, 7  ;;  %v1064_v21 = vrot.slane %v1048_v11, 1  ;;  %1171 = vst.msk [vmem:[#allocation2 + $0x8] sm:$0xf] %vm1168_vm3, %v1125_v57  ;;  %v1080_v7 = vpack.c.bf16 %v1048_v11, %v1048_v11 }
 0x123   : > { %v1056_v23 = vsel %vm790_vm6, %v1052_v20, %v1053_v55  ;;  %1276 = vrot.lane.b32.xlu1 %v1080_v7, %s2305_s11  ;;  %v1069_v24 = vsel %vm887_vm5, %v1063_v19, %v1064_v21  ;;  %v1068_v25 = vsel %vm887_vm5, %v1064_v21, %v1065_v56  ;;  %v1057_v31 = vsel %vm790_vm6, %v1051_v4, %v1052_v20 }
 0x124   : > { %v1061_v27 = vsel %vm2462_vm11, %v1056_v23, 0.0  ;;  %v1083_v30 = vpack.c.bf16 %v1069_v24, %v1069_v24  ;;  %v1072_v55 = vsel %vm2458_vm10, %v1068_v25, 0.0  ;;  %v1076_v54 = vpack.c.bf16 %v1057_v31, %v1057_v31 }
 0x125   : > { %v1210_v32 = vpop.permute.xlu2 %1209  ;;  %v1077_v34 = vpack.c.bf16 %v1061_v27, %v1061_v27  ;;  %v1084_v36 = vpack.c.bf16 %v1072_v55, %v1072_v55 }
 0x126   : > { %1254 = vst.msk [vmem:[#allocation2 + $0x10] sm:$0xf] %vm1249_vm8, %v1210_v32 }
 0x127   : > { %1294 = vrot.lane.b32.xlu0 %v1083_v30, %s2306_s12  ;;  %1268 = vst.msk [vmem:[#allocation2 + $0x48] sm:$0xf] %vm1087_vm7, %v1077_v34 }
 0x128   : > { %v1206_v56 = vpop.permute.xlu0 %1205  ;;  %v1127_v35 = vpop.permute.xlu1 %1126  ;;  %1288 = vst.msk [vmem:[#allocation2 + $0x48] sm:$0xf] %vm1168_vm3, %v2596_v5 }
 0x129   : > { %1252 = vst.msk [vmem:[#allocation2 + $0x8] sm:$0xf] %vm1249_vm8, %v1206_v56 }
 0x12a   : > { %1172 = vst.msk [vmem:[#allocation2 + $0xc] sm:$0xf] %vm1168_vm3, %v1127_v35 }
 0x12b   : > { %1296 = vrot.lane.b32.xlu1 %v1084_v36, %s2306_s12  ;;  %1267 = vst.msk [vmem:[#allocation2 + $0x44] sm:$0xf] %vm1087_vm7, %v1076_v54 }
 0x12f   : > { %1300 = vrot.lane.b32.xlu0 %v1086_v22, %s2306_s12 }
 0x131   : > { %v1208_v48 = vpop.permute.xlu1 %1207 }
 0x132   : > { %1253 = vst.msk [vmem:[#allocation2 + $0xc] sm:$0xf] %vm1249_vm8, %v1208_v48 }
 0x135   : > { %v1137_v58 = vpop.permute.xlu2 %1136 }
 0x136   : > { %1177 = vst.msk [vmem:[#allocation2 + $0x20] sm:$0xf] %vm1168_vm3, %v1137_v58 }
 0x13d   : > { %v1133_v5 = vpop.permute.xlu0 %1132  ;;  %v1216_v37 = vpop.permute.xlu2 %1215 }
 0x13e   : > { %1175 = vst.msk [vmem:[#allocation2 + $0x18] sm:$0xf] %vm1168_vm3, %v1133_v5 }
 0x145   : > { %v1212_v38 = vpop.permute.xlu0 %1211  ;;  %v1135_v28 = vpop.permute.xlu1 %1134 }
 0x146   : > { %1255 = vst.msk [vmem:[#allocation2 + $0x14] sm:$0xf] %vm1249_vm8, %v1212_v38 }
 0x147   : > { %1176 = vst.msk [vmem:[#allocation2 + $0x1c] sm:$0xf] %vm1168_vm3, %v1135_v28 }
 0x148   : > { %1257 = vst.msk [vmem:[#allocation2 + $0x1c] sm:$0xf] %vm1249_vm8, %v1216_v37 }
 0x14d   : > { %v1143_v39 = vpop.permute.xlu2 %1142  ;;  %v1214_v40 = vpop.permute.xlu1 %1213 }
 0x14e   : > { %1180 = vst.msk [vmem:[#allocation2 + $0x2c] sm:$0xf] %vm1168_vm3, %v1143_v39 }
 0x14f   : > { %1256 = vst.msk [vmem:[#allocation2 + $0x18] sm:$0xf] %vm1249_vm8, %v1214_v40 }
 0x155   : > { %v1139_v41 = vpop.permute.xlu0 %1138  ;;  %v1222_v42 = vpop.permute.xlu2 %1221 }
 0x156   : > { %1178 = vst.msk [vmem:[#allocation2 + $0x24] sm:$0xf] %vm1168_vm3, %v1139_v41 }
 0x15d   : > { %v1218_v43 = vpop.permute.xlu0 %1217  ;;  %v1141_v44 = vpop.permute.xlu1 %1140 }
 0x15e   : > { %1258 = vst.msk [vmem:[#allocation2 + $0x20] sm:$0xf] %vm1249_vm8, %v1218_v43 }
 0x15f   : > { %1179 = vst.msk [vmem:[#allocation2 + $0x28] sm:$0xf] %vm1168_vm3, %v1141_v44 }
 0x160   : > { %1260 = vst.msk [vmem:[#allocation2 + $0x28] sm:$0xf] %vm1249_vm8, %v1222_v42  ;;  %v1226_v45 = vpop.permute.xlu2 %1225 }
 0x165   : > { %v1220_v46 = vpop.permute.xlu1 %1219 }
 0x166   : > { %1259 = vst.msk [vmem:[#allocation2 + $0x24] sm:$0xf] %vm1249_vm8, %v1220_v46 }
 0x168   : > { %v1149_v47 = vpop.permute.xlu2 %1148 }
 0x169   : > { %1183 = vst.msk [vmem:[#allocation2 + $0x38] sm:$0xf] %vm1168_vm3, %v1149_v47 }
 0x16d   : > { %v1145_v49 = vpop.permute.xlu0 %1144 }
 0x16e   : > { %1181 = vst.msk [vmem:[#allocation2 + $0x30] sm:$0xf] %vm1168_vm3, %v1145_v49 }
 0x16f   : > { %1262 = vst.msk [vmem:[#allocation2 + $0x30] sm:$0xf] %vm1249_vm8, %v1226_v45 }
 0x171   : > { %v1232_v50 = vpop.permute.xlu2 %1231  ;;  %v1224_v51 = vpop.permute.xlu1 %1223 }
 0x172   : > { %1261 = vst.msk [vmem:[#allocation2 + $0x2c] sm:$0xf] %vm1249_vm8, %v1224_v51 }
 0x179   : > { %v1299_v52 = vpop.permute.xlu2 %1298  ;;  %v1147_v59 = vpop.permute.xlu1 %1146 }
 0x17a   : > { %1308 = vst.msk [vmem:[#allocation2 + $0x48] sm:$0xf] %vm1249_vm8, %v1299_v52 }
 0x17b   : > { %1182 = vst.msk [vmem:[#allocation2 + $0x34] sm:$0xf] %vm1168_vm3, %v1147_v59 }
 0x181   : > { %v1228_v60 = vpop.permute.xlu0 %1227 }
 0x182   : > { %1263 = vst.msk [vmem:[#allocation2 + $0x34] sm:$0xf] %vm1249_vm8, %v1228_v60 }
 0x188   : > { %v1230_v61 = vpop.permute.xlu1 %1229 }
 0x189   : > { %1264 = vst.msk [vmem:[#allocation2 + $0x38] sm:$0xf] %vm1249_vm8, %v1230_v61  ;;  %v1151_v62 = vpop.permute.xlu0 %1150 }
 0x18a   : > { %1184 = vst.msk [vmem:[#allocation2 + $0x3c] sm:$0xf] %vm1168_vm3, %v1151_v62 }
 0x18b   : > { %1265 = vst.msk [vmem:[#allocation2 + $0x3c] sm:$0xf] %vm1249_vm8, %v1232_v50 }
 0x191   : > { %v1275_v63 = vpop.permute.xlu0 %1274 }
 0x192   : > { %1286 = vst.msk [vmem:[#allocation2 + $0x40] sm:$0xf] %vm1168_vm3, %v1275_v63 }
 0x195   : > { %v1277_v29 = vpop.permute.xlu1 %1276 }
 0x196   : > { %1287 = vst.msk [vmem:[#allocation2 + $0x44] sm:$0xf] %vm1168_vm3, %v1277_v29 }
 0x199   : > { %v1295_v0 = vpop.permute.xlu0 %1294 }
 0x19a   : > { %1306 = vst.msk [vmem:[#allocation2 + $0x40] sm:$0xf] %vm1249_vm8, %v1295_v0 }
 0x19d   : > { %v1297_v1 = vpop.permute.xlu1 %1296 }
 0x19e   : > { %1307 = vst.msk [vmem:[#allocation2 + $0x44] sm:$0xf] %vm1249_vm8, %v1297_v1  ;;  %1313 = sbr.rel (%p2043_p9) target bundleno = 422 (0x1a6), region = 48 }
 0x1a1   : > { %v1301_v17 = vpop.permute.xlu0 %1300 }
 0x1a2   : > { %1309 = vst.msk [vmem:[#allocation2 + $0x4c] sm:$0xf] %vm1249_vm8, %v1301_v17 }
 0x1a3   : > { %vm1314_vm5 = vcmask 44032   ;;  %v2307_v33 = vmov 0  }
 0x1a4   : > { %1315 = vst.msk [vmem:[#allocation2] sm:$0xf] %vm1314_vm5, %v2307_v33 }
 0x1a5   : > { %1316 = vst.msk [vmem:[#allocation2 + $0x4] sm:$0xf] %vm1314_vm5, %v2307_v33 }
 0x1a6 PF: > { %p2044_p10 = scmp.ne.s32.totalorder %s2287_s21, 1 }
 0x1a8   : > { %1320 = sbr.rel (%p2044_p10) target bundleno = 432 (0x1b0), region = 52 }
 0x1ad   : > { %vm1321_vm6 = vcmask 44032   ;;  %v2308_v2 = vmov 0  }
 0x1ae   : > { %1322 = vst.msk [vmem:[#allocation2 + $0x48] sm:$0xf] %vm1321_vm6, %v2308_v2 }
 0x1af   : > { %1323 = vst.msk [vmem:[#allocation2 + $0x4c] sm:$0xf] %vm1321_vm6, %v2308_v2 }
 0x1b0 PF: > { %v2045_v3 = vld [vmem:[%s2836_s4 + $0x4] sm:$0x7]  ;;  %vm1410_vm7 = vcmask 1042432   ;;  %v1340_v4 = vld [vmem:[%s2836_s4] sm:$0x7]  ;;  %v2191_v10 = vld [vmem:[#allocation2 + $0x8] sm:$0xff] }
 0x1b1   : > { %v1412_v6 = vsel %vm1410_vm7, %v2045_v3, 0  ;;  %v1472_v8 = vsel %vm1410_vm7, %v1340_v4, 0  ;;  %v2098_v9 = vld [vmem:[%s2836_s4 + $0x8] sm:$0x7]  ;;  %v2190_v12 = vld [vmem:[#allocation2] sm:$0xff]  ;;  %vm1385_vm10 = vcmask 48128  }
 0x1b2   : > { %1421 = vmatpush.bf16.msra.mxu2 %v1412_v6  ;;  %1481 = vmatpush.bf16.msra.mxu3 %v1472_v8  ;;  %v1606_v13 = vsel %vm1410_vm7, %v2098_v9, 0  ;;  %v2199_v14 = vld [vmem:[#allocation2 + $0x10] sm:$0xff]  ;;  %v2200_v16 = vld [vmem:[#allocation2 + $0x18] sm:$0xff]  ;;  %v2201_v11 = vld [vmem:[#allocation2 + $0x20] sm:$0xff]  ;;  %vm1853_vm14 = vcmask 27648  }
 0x1b3   : > { %1615 = vmatpush.bf16.msrb.mxu1 %v1606_v13  ;;  %v2192_v15 = vld [vmem:[#allocation2 + $0x10] sm:$0xff]  ;;  %v2193_v18 = vld [vmem:[#allocation2 + $0x18] sm:$0xff]  ;;  %v2194_v57 = vld [vmem:[#allocation2 + $0x20] sm:$0xff] }
 0x1b4   : > { %v2202_v19 = vld [vmem:[#allocation2 + $0x28] sm:$0xff]  ;;  %v2203_v21 = vld [vmem:[#allocation2 + $0x30] sm:$0xff]  ;;  %v2204_v23 = vld [vmem:[#allocation2 + $0x38] sm:$0xff] }
 0x1b5   : > { %2078 = vmatmul.msk.bf16.vlgmr.msra.gmra.mxu2 %vm1385_vm10, %v2191_v10  ;;  %2090 = vmatmul.msk.bf16.vlgmr.msra.gmra.mxu3 %vm1385_vm10, %v2190_v12  ;;  %v2195_v20 = vld [vmem:[#allocation2 + $0x28] sm:$0xff]  ;;  %v2196_v7 = vld [vmem:[#allocation2 + $0x30] sm:$0xff]  ;;  %v2197_v24 = vld [vmem:[#allocation2 + $0x38] sm:$0xff] }
 0x1b6   : > { %2131 = vmatmul.msk.bf16.vlgmr.msrb.gmra.mxu1 %vm1385_vm10, %v2199_v14  ;;  %v2205_v25 = vld [vmem:[#allocation2 + $0x40] sm:$0xff]  ;;  %v2206_v30 = vld [vmem:[#allocation2 + $0x48] sm:$0xff]  ;;  %v2208_v50 = vld [vmem:[%s2383_s17 + $0x10] sm:$0xff] }
 0x1b7   : > { %v2198_v27 = vld [vmem:[#allocation2 + $0x40] sm:$0xff]  ;;  %v2207_v54 = vld [vmem:[%s2383_s17 + $0x8] sm:$0xff]  ;;  %v1807_v61 = vunpack.c.l.bf16 %v2208_v50  ;;  %v1808_v6 = vunpack.c.h.bf16 %v2208_v50 }
 0x1b8   : > { %v2759_v26 = vld [vmem:[%s2837_s5] ss:$0 sm:$0xff]  ;;  %v1805_v53 = vunpack.c.l.bf16 %v2207_v54  ;;  %v1806_v42 = vunpack.c.h.bf16 %v2207_v54 }
 0x1c5   : > { %2079 = vmatmul.msk.bf16.gmra.mxu2 %vm1385_vm10, %v2192_v15  ;;  %2091 = vmatmul.msk.bf16.gmra.mxu3 %vm1385_vm10, %v2191_v10 }
 0x1c6   : > { %2132 = vmatmul.msk.bf16.gmra.mxu1 %vm1385_vm10, %v2200_v16 }
 0x1d5   : > { %2080 = vmatmul.msk.bf16.gmra.mxu2 %vm1385_vm10, %v2193_v18  ;;  %2092 = vmatmul.msk.bf16.gmra.mxu3 %vm1385_vm10, %v2192_v15  ;;  %v2209_v15 = vld [vmem:[%s2383_s17 + $0x18] sm:$0xff] }
 0x1d6   : > { %2133 = vmatmul.msk.bf16.gmra.mxu1 %vm1385_vm10, %v2201_v11 }
 0x1e5   : > { %2081 = vmatmul.msk.bf16.gmra.mxu2 %vm1385_vm10, %v2194_v57  ;;  %2093 = vmatmul.msk.bf16.gmra.mxu3 %vm1385_vm10, %v2193_v18 }
 0x1e6   : > { %2134 = vmatmul.msk.bf16.gmra.mxu1 %vm1385_vm10, %v2202_v19  ;;  %v1809_v19 = vunpack.c.l.bf16 %v2209_v15 }
 0x1f5   : > { %2082 = vmatmul.msk.bf16.gmra.mxu2 %vm1385_vm10, %v2195_v20  ;;  %2094 = vmatmul.msk.bf16.gmra.mxu3 %vm1385_vm10, %v2194_v57 }
 0x1f6   : > { %2135 = vmatmul.msk.bf16.gmra.mxu1 %vm1385_vm10, %v2203_v21 }
 0x205   : > { %2083 = vmatmul.msk.bf16.gmra.mxu2 %vm1385_vm10, %v2196_v7  ;;  %2095 = vmatmul.msk.bf16.gmra.mxu3 %vm1385_vm10, %v2195_v20 }
 0x206   : > { %2136 = vmatmul.msk.bf16.gmra.mxu1 %vm1385_vm10, %v2204_v23 }
 0x215   : > { %2084 = vmatmul.msk.bf16.gmra.mxu2 %vm1385_vm10, %v2197_v24  ;;  %2096 = vmatmul.msk.bf16.gmra.mxu3 %vm1385_vm10, %v2196_v7 }
 0x216   : > { %2137 = vmatmul.msk.bf16.gmra.mxu1 %vm1385_vm10, %v2205_v25 }
 0x225   : > { %2085 = vmatmul.msk.bf16.gmra.mxu2 %vm1385_vm10, %v2198_v27  ;;  %2097 = vmatmul.msk.bf16.gmra.mxu3 %vm1385_vm10, %v2197_v24 }
 0x226   : > { %2138 = vmatmul.msk.bf16.gmra.mxu1 %vm1385_vm10, %v2206_v30 }
 0x233   : > { %v1617_v31 = vpop.f32.mrf.mxu1 }
 0x238   : > { %v1423_v32 = vpop.f32.mrf.mxu2  ;;  %v1483_v34 = vpop.f32.mrf.mxu3 }
 0x239   : > { %v1484_v55 = vadd.f32 %v1483_v34, %v1423_v32  ;;  %v1810_v34 = vunpack.c.h.bf16 %v2209_v15 }
 0x23b   : > { %v1657_v56 = vadd.f32 %v1617_v31, %v1484_v55  ;;  %v1619_v35 = vpop.f32.mrf.mxu1 }
 0x23d   : > { %v1677_v36 = vadd.f32 %v2759_v26, %v1657_v56 }
 0x23f   : > { %vm1693_vm11 = vcmp.ge.f32.partialorder %v1677_v36, 0.0  ;;  %v1709_v22 = vmul.f32 0.1, %v1677_v36 }
 0x240   : > { %v1425_v48 = vpop.f32.mrf.mxu2  ;;  %v1485_v58 = vpop.f32.mrf.mxu3 }
 0x241   : > { %v1725_v5 = vsel %vm1693_vm11, %v1677_v36, %v1709_v22  ;;  %v1486_v37 = vadd.f32 %v1485_v58, %v1425_v48  ;;  %v2210_v22 = vld [vmem:[%s2383_s17 + $0x20] sm:$0xff] }
 0x242   : > { %v1821_v38 = vadd.f32 %v1805_v53, %v1725_v5 }
 0x243   : > { %v1658_v28 = vadd.f32 %v1619_v35, %v1486_v37  ;;  %v1622_v39 = vpop.f32.mrf.mxu1 }
 0x244   : > { %v1837_v40 = vpack.c.bf16 %v1821_v38, %v1821_v38  ;;  %v1811_v38 = vunpack.c.l.bf16 %v2210_v22 }
 0x245   : > { %v1678_v41 = vadd.f32 %v2759_v26, %v1658_v28 }
 0x246   : > { %1854 = vst.msk [vmem:[%s2388_s22] sm:$0xf] %vm1853_vm14, %v1837_v40 }
 0x247   : > { %vm1694_vm12 = vcmp.ge.f32.partialorder %v1678_v41, 0.0  ;;  %v1710_v43 = vmul.f32 0.1, %v1678_v41 }
 0x248   : > { %v1428_v44 = vpop.f32.mrf.mxu2  ;;  %v1488_v45 = vpop.f32.mrf.mxu3 }
 0x249   : > { %v1726_v46 = vsel %vm1694_vm12, %v1678_v41, %v1710_v43  ;;  %v1489_v47 = vadd.f32 %v1488_v45, %v1428_v44 }
 0x24a   : > { %v1822_v49 = vadd.f32 %v1806_v42, %v1726_v46 }
 0x24b   : > { %v1659_v51 = vadd.f32 %v1622_v39, %v1489_v47  ;;  %v1624_v52 = vpop.f32.mrf.mxu1 }
 0x24c   : > { %v1838_v59 = vpack.c.bf16 %v1822_v49, %v1822_v49  ;;  %v1812_v49 = vunpack.c.h.bf16 %v2210_v22 }
 0x24d   : > { %v1679_v60 = vadd.f32 %v2759_v26, %v1659_v51 }
 0x24e   : > { %1855 = vst.msk [vmem:[%s2388_s22 + $0x4] sm:$0xf] %vm1853_vm14, %v1838_v59 }
 0x24f   : > { %vm1695_vm13 = vcmp.ge.f32.partialorder %v1679_v60, 0.0  ;;  %v1711_v62 = vmul.f32 0.1, %v1679_v60 }
 0x250   : > { %v1430_v63 = vpop.f32.mrf.mxu2  ;;  %v1490_v29 = vpop.f32.mrf.mxu3 }
 0x251   : > { %v1727_v0 = vsel %vm1695_vm13, %v1679_v60, %v1711_v62  ;;  %v1491_v1 = vadd.f32 %v1490_v29, %v1430_v63  ;;  %v2211_v62 = vld [vmem:[%s2383_s17 + $0x28] sm:$0xff] }
 0x252   : > { %v1823_v17 = vadd.f32 %v1807_v61, %v1727_v0 }
 0x253   : > { %v1660_v33 = vadd.f32 %v1624_v52, %v1491_v1  ;;  %v1627_v2 = vpop.f32.mrf.mxu1 }
 0x254   : > { %v1839_v3 = vpack.c.bf16 %v1823_v17, %v1823_v17  ;;  %v1813_v17 = vunpack.c.l.bf16 %v2211_v62 }
 0x255   : > { %v1680_v4 = vadd.f32 %v2759_v26, %v1660_v33 }
 0x256   : > { %1856 = vst.msk [vmem:[%s2388_s22 + $0x8] sm:$0xf] %vm1853_vm14, %v1839_v3 }
 0x257   : > { %vm1696_vm15 = vcmp.ge.f32.partialorder %v1680_v4, 0.0  ;;  %v1712_v8 = vmul.f32 0.1, %v1680_v4 }
 0x258   : > { %v1433_v9 = vpop.f32.mrf.mxu2  ;;  %v1493_v10 = vpop.f32.mrf.mxu3 }
 0x259   : > { %v1728_v12 = vsel %vm1696_vm15, %v1680_v4, %v1712_v8  ;;  %v1494_v13 = vadd.f32 %v1493_v10, %v1433_v9 }
 0x25a   : > { %v1824_v14 = vadd.f32 %v1808_v6, %v1728_v12 }
 0x25b   : > { %v1661_v16 = vadd.f32 %v1627_v2, %v1494_v13  ;;  %v1629_v18 = vpop.f32.mrf.mxu1 }
 0x25c   : > { %v1840_v11 = vpack.c.bf16 %v1824_v14, %v1824_v14  ;;  %v1814_v14 = vunpack.c.h.bf16 %v2211_v62 }
 0x25d   : > { %v1681_v57 = vadd.f32 %v2759_v26, %v1661_v16 }
 0x25e   : > { %1857 = vst.msk [vmem:[%s2388_s22 + $0xc] sm:$0xf] %vm1853_vm14, %v1840_v11 }
 0x25f   : > { %vm1697_vm0 = vcmp.ge.f32.partialorder %v1681_v57, 0.0  ;;  %v1713_v20 = vmul.f32 0.1, %v1681_v57 }
 0x260   : > { %v1435_v21 = vpop.f32.mrf.mxu2  ;;  %v1495_v7 = vpop.f32.mrf.mxu3 }
 0x261   : > { %v1729_v23 = vsel %vm1697_vm0, %v1681_v57, %v1713_v20  ;;  %v1496_v24 = vadd.f32 %v1495_v7, %v1435_v21  ;;  %v2212_v20 = vld [vmem:[%s2383_s17 + $0x30] sm:$0xff] }
 0x262   : > { %v1825_v25 = vadd.f32 %v1809_v19, %v1729_v23 }
 0x263   : > { %v1662_v27 = vadd.f32 %v1629_v18, %v1496_v24  ;;  %v1632_v30 = vpop.f32.mrf.mxu1 }
 0x264   : > { %v1841_v31 = vpack.c.bf16 %v1825_v25, %v1825_v25  ;;  %v1815_v25 = vunpack.c.l.bf16 %v2212_v20 }
 0x265   : > { %v1682_v32 = vadd.f32 %v2759_v26, %v1662_v27 }
 0x266   : > { %1858 = vst.msk [vmem:[%s2388_s22 + $0x10] sm:$0xf] %vm1853_vm14, %v1841_v31 }
 0x267   : > { %vm1698_vm1 = vcmp.ge.f32.partialorder %v1682_v32, 0.0  ;;  %v1714_v55 = vmul.f32 0.1, %v1682_v32 }
 0x268   : > { %v1438_v54 = vpop.f32.mrf.mxu2  ;;  %v1498_v56 = vpop.f32.mrf.mxu3 }
 0x269   : > { %v1730_v35 = vsel %vm1698_vm1, %v1682_v32, %v1714_v55  ;;  %v1499_v36 = vadd.f32 %v1498_v56, %v1438_v54 }
 0x26a   : > { %v1826_v53 = vadd.f32 %v1810_v34, %v1730_v35 }
 0x26b   : > { %v1663_v48 = vadd.f32 %v1632_v30, %v1499_v36  ;;  %v1634_v58 = vpop.f32.mrf.mxu1 }
 0x26c   : > { %v1842_v5 = vpack.c.bf16 %v1826_v53, %v1826_v53  ;;  %v1816_v53 = vunpack.c.h.bf16 %v2212_v20 }
 0x26d   : > { %v1683_v37 = vadd.f32 %v2759_v26, %v1663_v48 }
 0x26e   : > { %1859 = vst.msk [vmem:[%s2388_s22 + $0x14] sm:$0xf] %vm1853_vm14, %v1842_v5 }
 0x26f   : > { %vm1699_vm2 = vcmp.ge.f32.partialorder %v1683_v37, 0.0  ;;  %v1715_v28 = vmul.f32 0.1, %v1683_v37 }
 0x270   : > { %v1440_v39 = vpop.f32.mrf.mxu2  ;;  %v1500_v40 = vpop.f32.mrf.mxu3 }
 0x271   : > { %v1731_v41 = vsel %vm1699_vm2, %v1683_v37, %v1715_v28  ;;  %v1501_v42 = vadd.f32 %v1500_v40, %v1440_v39  ;;  %v2213_v28 = vld [vmem:[%s2383_s17 + $0x38] sm:$0xff] }
 0x272   : > { %v1827_v43 = vadd.f32 %v1811_v38, %v1731_v41 }
 0x273   : > { %v1664_v44 = vadd.f32 %v1634_v58, %v1501_v42  ;;  %v1637_v45 = vpop.f32.mrf.mxu1 }
 0x274   : > { %v1843_v46 = vpack.c.bf16 %v1827_v43, %v1827_v43  ;;  %v1817_v43 = vunpack.c.l.bf16 %v2213_v28 }
 0x275   : > { %v1684_v47 = vadd.f32 %v2759_v26, %v1664_v44 }
 0x276   : > { %1860 = vst.msk [vmem:[%s2388_s22 + $0x18] sm:$0xf] %vm1853_vm14, %v1843_v46 }
 0x277   : > { %vm1700_vm3 = vcmp.ge.f32.partialorder %v1684_v47, 0.0  ;;  %v1716_v50 = vmul.f32 0.1, %v1684_v47 }
 0x278   : > { %v1443_v51 = vpop.f32.mrf.mxu2  ;;  %v1503_v52 = vpop.f32.mrf.mxu3 }
 0x279   : > { %v1732_v59 = vsel %vm1700_vm3, %v1684_v47, %v1716_v50  ;;  %v1504_v60 = vadd.f32 %v1503_v52, %v1443_v51 }
 0x27a   : > { %v1828_v61 = vadd.f32 %v1812_v49, %v1732_v59 }
 0x27b   : > { %v1665_v63 = vadd.f32 %v1637_v45, %v1504_v60  ;;  %v1639_v29 = vpop.f32.mrf.mxu1  ;;  %v1818_v60 = vunpack.c.h.bf16 %v2213_v28 }
 0x27c   : > { %v1844_v0 = vpack.c.bf16 %v1828_v61, %v1828_v61 }
 0x27d   : > { %v1685_v1 = vadd.f32 %v2759_v26, %v1665_v63 }
 0x27e   : > { %1861 = vst.msk [vmem:[%s2388_s22 + $0x1c] sm:$0xf] %vm1853_vm14, %v1844_v0 }
 0x27f   : > { %vm1701_vm4 = vcmp.ge.f32.partialorder %v1685_v1, 0.0  ;;  %v1717_v33 = vmul.f32 0.1, %v1685_v1 }
 0x280   : > { %v1445_v2 = vpop.f32.mrf.mxu2  ;;  %v1505_v3 = vpop.f32.mrf.mxu3 }
 0x281   : > { %v1733_v4 = vsel %vm1701_vm4, %v1685_v1, %v1717_v33  ;;  %v1506_v6 = vadd.f32 %v1505_v3, %v1445_v2  ;;  %v2214_v33 = vld [vmem:[%s2395_s9] sm:$0xff] }
 0x282   : > { %v1829_v8 = vadd.f32 %v1813_v17, %v1733_v4 }
 0x283   : > { %v1666_v9 = vadd.f32 %v1639_v29, %v1506_v6  ;;  %v1642_v10 = vpop.f32.mrf.mxu1  ;;  %v1819_v6 = vunpack.c.l.bf16 %v2214_v33 }
 0x284   : > { %v1845_v12 = vpack.c.bf16 %v1829_v8, %v1829_v8 }
 0x285   : > { %v1686_v13 = vadd.f32 %v2759_v26, %v1666_v9 }
 0x286   : > { %1862 = vst.msk [vmem:[%s2388_s22 + $0x20] sm:$0xf] %vm1853_vm14, %v1845_v12 }
 0x287   : > { %vm1702_vm8 = vcmp.ge.f32.partialorder %v1686_v13, 0.0  ;;  %v1718_v15 = vmul.f32 0.1, %v1686_v13 }
 0x288   : > { %v1448_v16 = vpop.f32.mrf.mxu2  ;;  %v1508_v18 = vpop.f32.mrf.mxu3 }
 0x289   : > { %v1734_v11 = vsel %vm1702_vm8, %v1686_v13, %v1718_v15  ;;  %v1509_v57 = vadd.f32 %v1508_v18, %v1448_v16 }
 0x28a   : > { %v1830_v19 = vadd.f32 %v1814_v14, %v1734_v11 }
 0x28b   : > { %v1667_v21 = vadd.f32 %v1642_v10, %v1509_v57  ;;  %v1644_v7 = vpop.f32.mrf.mxu1  ;;  %v1820_v57 = vunpack.c.h.bf16 %v2214_v33 }
 0x28c   : > { %v1846_v23 = vpack.c.bf16 %v1830_v19, %v1830_v19 }
 0x28d   : > { %v1687_v24 = vadd.f32 %v2759_v26, %v1667_v21 }
 0x28e   : > { %1863 = vst.msk [vmem:[%s2388_s22 + $0x24] sm:$0xf] %vm1853_vm14, %v1846_v23 }
 0x28f   : > { %vm1703_vm9 = vcmp.ge.f32.partialorder %v1687_v24, 0.0  ;;  %v1719_v27 = vmul.f32 0.1, %v1687_v24 }
 0x290   : > { %v1450_v30 = vpop.f32.mrf.mxu2  ;;  %v1510_v31 = vpop.f32.mrf.mxu3 }
 0x291   : > { %v1735_v32 = vsel %vm1703_vm9, %v1687_v24, %v1719_v27  ;;  %v1511_v34 = vadd.f32 %v1510_v31, %v1450_v30 }
 0x292   : > { %v1831_v55 = vadd.f32 %v1815_v25, %v1735_v32 }
 0x293   : > { %v1668_v54 = vadd.f32 %v1644_v7, %v1511_v34  ;;  %v1647_v56 = vpop.f32.mrf.mxu1 }
 0x294   : > { %v1847_v35 = vpack.c.bf16 %v1831_v55, %v1831_v55 }
 0x295   : > { %v1688_v36 = vadd.f32 %v2759_v26, %v1668_v54 }
 0x296   : > { %1864 = vst.msk [vmem:[%s2388_s22 + $0x28] sm:$0xf] %vm1853_vm14, %v1847_v35 }
 0x297   : > { %vm1704_vm5 = vcmp.ge.f32.partialorder %v1688_v36, 0.0  ;;  %v1720_v22 = vmul.f32 0.1, %v1688_v36 }
 0x298   : > { %v1453_v48 = vpop.f32.mrf.mxu2  ;;  %v1513_v58 = vpop.f32.mrf.mxu3 }
 0x299   : > { %v1736_v5 = vsel %vm1704_vm5, %v1688_v36, %v1720_v22  ;;  %v1514_v37 = vadd.f32 %v1513_v58, %v1453_v48 }
 0x29a   : > { %v1832_v38 = vadd.f32 %v1816_v53, %v1736_v5 }
 0x29b   : > { %v1669_v39 = vadd.f32 %v1647_v56, %v1514_v37  ;;  %v1649_v42 = vpop.f32.mrf.mxu1 }
 0x29c   : > { %v1848_v40 = vpack.c.bf16 %v1832_v38, %v1832_v38 }
 0x29d   : > { %v1689_v41 = vadd.f32 %v2759_v26, %v1669_v39 }
 0x29e   : > { %1865 = vst.msk [vmem:[%s2388_s22 + $0x2c] sm:$0xf] %vm1853_vm14, %v1848_v40 }
 0x29f   : > { %vm1705_vm6 = vcmp.ge.f32.partialorder %v1689_v41, 0.0  ;;  %v1721_v44 = vmul.f32 0.1, %v1689_v41 }
 0x2a0   : > { %v1455_v45 = vpop.f32.mrf.mxu2  ;;  %v1515_v46 = vpop.f32.mrf.mxu3 }
 0x2a1   : > { %v1737_v47 = vsel %vm1705_vm6, %v1689_v41, %v1721_v44  ;;  %v1516_v49 = vadd.f32 %v1515_v46, %v1455_v45 }
 0x2a2   : > { %v1833_v50 = vadd.f32 %v1817_v43, %v1737_v47 }
 0x2a3   : > { %v1670_v51 = vadd.f32 %v1649_v42, %v1516_v49  ;;  %v1652_v62 = vpop.f32.mrf.mxu1 }
 0x2a4   : > { %v1849_v52 = vpack.c.bf16 %v1833_v50, %v1833_v50 }
 0x2a5   : > { %v1690_v59 = vadd.f32 %v2759_v26, %v1670_v51 }
 0x2a6   : > { %1866 = vst.msk [vmem:[%s2388_s22 + $0x30] sm:$0xf] %vm1853_vm14, %v1849_v52 }
 0x2a7   : > { %vm1706_vm7 = vcmp.ge.f32.partialorder %v1690_v59, 0.0  ;;  %v1722_v61 = vmul.f32 0.1, %v1690_v59 }
 0x2a8   : > { %v1458_v63 = vpop.f32.mrf.mxu2  ;;  %v1518_v29 = vpop.f32.mrf.mxu3 }
 0x2a9   : > { %v1738_v0 = vsel %vm1706_vm7, %v1690_v59, %v1722_v61  ;;  %v1519_v1 = vadd.f32 %v1518_v29, %v1458_v63 }
 0x2aa   : > { %v1834_v17 = vadd.f32 %v1818_v60, %v1738_v0 }
 0x2ab   : > { %v1671_v2 = vadd.f32 %v1652_v62, %v1519_v1  ;;  %v1654_v15 = vpop.f32.mrf.mxu1 }
 0x2ac   : > { %v1850_v3 = vpack.c.bf16 %v1834_v17, %v1834_v17 }
 0x2ad   : > { %v1691_v4 = vadd.f32 %v2759_v26, %v1671_v2 }
 0x2ae   : > { %1867 = vst.msk [vmem:[%s2388_s22 + $0x34] sm:$0xf] %vm1853_vm14, %v1850_v3 }
 0x2af   : > { %vm1707_vm10 = vcmp.ge.f32.partialorder %v1691_v4, 0.0  ;;  %v1723_v8 = vmul.f32 0.1, %v1691_v4 }
 0x2b0   : > { %v1460_v9 = vpop.f32.mrf.mxu2  ;;  %v1520_v10 = vpop.f32.mrf.mxu3 }
 0x2b1   : > { %v1739_v12 = vsel %vm1707_vm10, %v1691_v4, %v1723_v8  ;;  %v1521_v13 = vadd.f32 %v1520_v10, %v1460_v9 }
 0x2b2   : > { %v1835_v14 = vadd.f32 %v1819_v6, %v1739_v12 }
 0x2b3   : > { %v1672_v16 = vadd.f32 %v1654_v15, %v1521_v13 }
 0x2b4   : > { %v1851_v18 = vpack.c.bf16 %v1835_v14, %v1835_v14 }
 0x2b5   : > { %v1692_v11 = vadd.f32 %v2759_v26, %v1672_v16 }
 0x2b6   : > { %1868 = vst.msk [vmem:[%s2388_s22 + $0x38] sm:$0xf] %vm1853_vm14, %v1851_v18 }
 0x2b7   : > { %vm1708_vm11 = vcmp.ge.f32.partialorder %v1692_v11, 0.0  ;;  %v1724_v19 = vmul.f32 0.1, %v1692_v11 }
 0x2b9   : > { %v1740_v20 = vsel %vm1708_vm11, %v1692_v11, %v1724_v19 }
 0x2ba   : > { %v1836_v21 = vadd.f32 %v1820_v57, %v1740_v20 }
 0x2bc   : > { %v1852_v7 = vpack.c.bf16 %v1836_v21, %v1836_v21 }
 0x2be   : > { %1869 = vst.msk [vmem:[%s2388_s22 + $0x3c] sm:$0xf] %vm1853_vm14, %v1852_v7 }
 0x2bf PF: > { %s16_s25 = sadd.s32 1, %s2303_s25   ;;  %s2847_s21 = smov %s2295_s23 }
 0x2c0   : > { %p13_p11 = scmp.ge.s32.totalorder %s16_s25, 6   ;;  %s2848_s22 = smov %s2299_s24 }
 0x2c1   : > { %s2849_s23 = smov %s2852_s26  ;;  %s2850_s24 = smov %s2856_s27 }
 0x2c2   :  { %15 = sbr.rel (!%p13_p11) target bundleno = 3 (0x3), region = 87 }

</bundles_post_ra>
